<compile_context>
chip_gen: v7x
topology: tpu7x:2x2x1
jax: 0.10.0
libtpu: 0.0.40
codegen_flags: <defaults>
</compile_context>

<pallas_src>
import functools
import math

import jax
import jax.numpy as jnp
from jax.experimental import pallas as pl
from jax.experimental.pallas import tpu as pltpu


def _layer_norm(h, gamma, beta, eps=1e-5):
    mu = jnp.mean(h, axis=-1, keepdims=True)
    var = jnp.mean((h - mu) ** 2, axis=-1, keepdims=True)
    return (h - mu) * jax.lax.rsqrt(var + eps) * gamma + beta


def encoder_layer_kernel(mask_ref, x_ref,
                         wq_ref, bq_ref, wk_ref, bk_ref, wv_ref, bv_ref,
                         wo_ref, bo_ref,
                         g1_ref, be1_ref, g2_ref, be2_ref,
                         wf1_ref, bf1_ref, wf2_ref, bf2_ref,
                         out_ref, *, num_heads, d_k, precise):
    mxu = jnp.float32 if precise else jnp.bfloat16   # MXU operand dtype (f32 accum always)
    Bb, T, C = x_ref.shape
    M = Bb * T

    # Flatten the batch block -> fat-M matmuls for all projections / FFN.
    x = x_ref[...].astype(jnp.float32).reshape(M, C)

    # ---------------- pre-LN + fused QKV projections (3 big (M,C)@(C,C) matmuls) --------
    ln1 = _layer_norm(x, g1_ref[...], be1_ref[...])
    ln1_m = ln1.astype(mxu)
    q = jnp.dot(ln1_m, wq_ref[...].astype(mxu),
                preferred_element_type=jnp.float32) + bq_ref[...]
    k = jnp.dot(ln1_m, wk_ref[...].astype(mxu),
                preferred_element_type=jnp.float32) + bk_ref[...]
    v = jnp.dot(ln1_m, wv_ref[...].astype(mxu),
                preferred_element_type=jnp.float32) + bv_ref[...]

    q3 = q.reshape(Bb, T, C)
    k3 = k.reshape(Bb, T, C)
    v3 = v.reshape(Bb, T, C)

    # Additive key mask, hoisted out of the head loop (computed once per block).
    mbias = jnp.where(mask_ref[...] > 0, jnp.float32(0.0), jnp.float32(-1e9))  # (Bb,1,T)

    scale = 1.0 / math.sqrt(d_k)
    dn_qk = (((2,), (2,)), ((0,), (0,)))   # 'btd,bsd->bts'
    dn_pv = (((2,), (1,)), ((0,), (0,)))   # 'bts,bsd->btd'

    head_outs = []
    for h in range(num_heads):             # static loop over heads; batched over Bb inside
        lo = h * d_k
        qh = q3[:, :, lo:lo + d_k].astype(mxu)
        kh = k3[:, :, lo:lo + d_k].astype(mxu)
        vh = v3[:, :, lo:lo + d_k].astype(mxu)

        s = jax.lax.dot_general(qh, kh, dn_qk,
                                preferred_element_type=jnp.float32) * scale  # (Bb,T,T)
        s = s + mbias                                   # mask key positions
        s = s - jnp.max(s, axis=-1, keepdims=True)      # softmax in f32
        e = jnp.exp(s)
        denom = jnp.sum(e, axis=-1, keepdims=True)
        if precise:
            p = e / denom
        else:
            p = e * pl.reciprocal(denom, approx=True)   # EUP slot, essentially free
        oh = jax.lax.dot_general(p.astype(mxu), vh, dn_pv,
                                 preferred_element_type=jnp.float32)         # (Bb,T,d_k)
        head_outs.append(oh)

    # Assemble all heads once, then a single (M,C)@(C,C) output projection.
    attn = jnp.concatenate(head_outs, axis=-1).reshape(M, C)
    attn = jnp.dot(attn.astype(mxu), wo_ref[...].astype(mxu),
                   preferred_element_type=jnp.float32) + bo_ref[...]
    y = x + attn                                         # residual (dropout = identity)

    # ---------------- pre-LN feed-forward ----------------
    ln2 = _layer_norm(y, g2_ref[...], be2_ref[...])
    hid = jnp.dot(ln2.astype(mxu), wf1_ref[...].astype(mxu),
                  preferred_element_type=jnp.float32) + bf1_ref[...]
    hid = jnp.maximum(hid, 0.0)
    ff = jnp.dot(hid.astype(mxu), wf2_ref[...].astype(mxu),
                 preferred_element_type=jnp.float32) + bf2_ref[...]

    out_ref[...] = (y + ff).reshape(Bb, T, C).astype(out_ref.dtype)


def _pick_block_b(B, T, target_rows=256):
    """Largest divisor of B such that block_b*T <= target_rows (fat-M without huge tiles)."""
    cap = max(1, target_rows // max(T, 1))
    best = 1
    for bb in range(1, B + 1):
        if B % bb == 0 and bb <= cap:
            best = bb
    return best


def encoder_layer(x, mask, params, *, num_heads, d_k, precise=False, block_b=None):
    B, T, C = x.shape
    d_ff = params["wf1"].shape[1]
    if block_b is None:
        block_b = _pick_block_b(B, T)
    assert B % block_b == 0

    param_order = ("wq", "bq", "wk", "bk", "wv", "bv", "wo", "bo",
                   "g1", "be1", "g2", "be2", "wf1", "bf1", "wf2", "bf2")
    param_arrays = [params[name] for name in param_order]

    def full_spec(arr):
        nd = arr.ndim
        return pl.BlockSpec(arr.shape, lambda b, _n=nd: (0,) * _n)

    in_specs = [
        pl.BlockSpec((block_b, 1, T), lambda b: (b, 0, 0)),   # mask (B,1,T)
        pl.BlockSpec((block_b, T, C), lambda b: (b, 0, 0)),   # x    (B,T,C)
    ] + [full_spec(a) for a in param_arrays]

    kernel = functools.partial(encoder_layer_kernel,
                               num_heads=num_heads, d_k=d_k, precise=precise)

    # Advisory cost estimate so XLA can schedule around the custom call.
    flops = 2 * B * T * (4 * C * C + 2 * T * C + 2 * C * d_ff)
    transcendentals = B * num_heads * T * T
    bytes_accessed = 4 * (2 * x.size + mask.size + sum(a.size for a in param_arrays))

    return pl.pallas_call(
        kernel,
        out_shape=jax.ShapeDtypeStruct((B, T, C), x.dtype),
        grid=(B // block_b,),
        in_specs=in_specs,
        out_specs=pl.BlockSpec((block_b, T, C), lambda b: (b, 0, 0)),
        compiler_params=pltpu.CompilerParams(dimension_semantics=("parallel",)),
        cost_estimate=pl.CostEstimate(flops=flops, transcendentals=transcendentals,
                                      bytes_accessed=bytes_accessed),
    )(mask, x, *param_arrays)


def reference(x, mask, p, num_heads, d_k):
    """Pure-JAX f32 reference matching the PyTorch EncoderLayer semantics (eval mode)."""
    def ln(h, g, b, eps=1e-5):
        mu = h.mean(-1, keepdims=True)
        var = ((h - mu) ** 2).mean(-1, keepdims=True)
        return (h - mu) / jnp.sqrt(var + eps) * g + b

    B, T, C = x.shape
    ln1 = ln(x, p["g1"], p["be1"])
    q = ln1 @ p["wq"] + p["bq"]
    k = ln1 @ p["wk"] + p["bk"]
    v = ln1 @ p["wv"] + p["bv"]
    qh = q.reshape(B, T, num_heads, d_k).transpose(0, 2, 1, 3)
    kh = k.reshape(B, T, num_heads, d_k).transpose(0, 2, 1, 3)
    vh = v.reshape(B, T, num_heads, d_k).transpose(0, 2, 1, 3)
    s = jnp.einsum("bhtd,bhsd->bhts", qh, kh) / jnp.sqrt(jnp.float32(d_k))
    s = jnp.where(mask[:, None, :, :] > 0, s, -1e9)
    a = jax.nn.softmax(s, axis=-1)
    o = jnp.einsum("bhts,bhsd->bhtd", a, vh).transpose(0, 2, 1, 3).reshape(B, T, C)
    y = x + (o @ p["wo"] + p["bo"])
    ln2 = ln(y, p["g2"], p["be2"])
    ff = jnp.maximum(ln2 @ p["wf1"] + p["bf1"], 0.0) @ p["wf2"] + p["bf2"]
    return y + ff


if __name__ == "__main__":
    # Small shapes consistent with the module: B=2, T=8, d_model=32, heads=4, d_k=8, d_ff=64
    B, T = 2, 8
    num_heads, d_k = 4, 8
    d_model = num_heads * d_k            # 32
    d_ff = 64

    key = jax.random.PRNGKey(0)
    keys = jax.random.split(key, 12)

    def init(k, shape, scale=0.1):
        return jax.random.normal(k, shape, jnp.float32) * scale

    params = {
        "wq": init(keys[0], (d_model, num_heads * d_k)),
        "bq": init(keys[1], (1, num_heads * d_k)),
        "wk": init(keys[2], (d_model, num_heads * d_k)),
        "bk": init(keys[3], (1, num_heads * d_k)),
        "wv": init(keys[4], (d_model, num_heads * d_k)),
        "bv": init(keys[5], (1, num_heads * d_k)),
        "wo": init(keys[6], (num_heads * d_k, d_model)),
        "bo": init(keys[7], (1, d_model)),
        "g1": jnp.ones((1, d_model), jnp.float32),
        "be1": jnp.zeros((1, d_model), jnp.float32),
        "g2": jnp.ones((1, d_model), jnp.float32),
        "be2": jnp.zeros((1, d_model), jnp.float32),
        "wf1": init(keys[8], (d_model, d_ff)),
        "bf1": init(keys[9], (1, d_ff)),
        "wf2": init(keys[10], (d_ff, d_model)),
        "bf2": init(keys[11], (1, d_model)),
    }

    x = jax.random.normal(jax.random.PRNGKey(1), (B, T, d_model), jnp.float32)
    # slf_attn_mask: (B, 1, T); 1 = attend, 0 = masked key position
    mask = jnp.ones((B, 1, T), jnp.float32).at[1, 0, 6:].set(0.0)

    ref = reference(x, mask, params, num_heads, d_k)

    # Tight correctness check with f32 MXU operands / exact softmax divide.
    out_f32 = jax.block_until_ready(
        encoder_layer(x, mask, params, num_heads=num_heads, d_k=d_k, precise=True))
    assert out_f32.shape == (B, T, d_model)
    err_f32 = jnp.max(jnp.abs(out_f32 - ref))
    assert err_f32 < 1e-4, f"f32-mode max abs err {err_f32}"

    # Performance mode: bf16 MXU operands, f32 accumulation, approx reciprocal.
    out_bf16 = jax.block_until_ready(
        encoder_layer(x, mask, params, num_heads=num_heads, d_k=d_k, precise=False))
    err_bf16 = jnp.max(jnp.abs(out_bf16 - ref))
    assert err_bf16 < 5e-2, f"bf16-mode max abs err {err_bf16}"

    print("KERNEL_OK")
</pallas_src>

<mosaic_0001>
module attributes {stable_mosaic.version = 11 : i64} {
  func.func @encoder_layer_kernel(%arg0: i32, %arg1: memref<2x1x8xf32, #tpu.memory_space<vmem>>, %arg2: memref<2x8x32xf32, #tpu.memory_space<vmem>>, %arg3: memref<32x32xf32, #tpu.memory_space<vmem>>, %arg4: memref<1x32xf32, #tpu.memory_space<vmem>>, %arg5: memref<32x32xf32, #tpu.memory_space<vmem>>, %arg6: memref<1x32xf32, #tpu.memory_space<vmem>>, %arg7: memref<32x32xf32, #tpu.memory_space<vmem>>, %arg8: memref<1x32xf32, #tpu.memory_space<vmem>>, %arg9: memref<32x32xf32, #tpu.memory_space<vmem>>, %arg10: memref<1x32xf32, #tpu.memory_space<vmem>>, %arg11: memref<1x32xf32, #tpu.memory_space<vmem>>, %arg12: memref<1x32xf32, #tpu.memory_space<vmem>>, %arg13: memref<1x32xf32, #tpu.memory_space<vmem>>, %arg14: memref<1x32xf32, #tpu.memory_space<vmem>>, %arg15: memref<32x64xf32, #tpu.memory_space<vmem>>, %arg16: memref<1x64xf32, #tpu.memory_space<vmem>>, %arg17: memref<64x32xf32, #tpu.memory_space<vmem>>, %arg18: memref<1x32xf32, #tpu.memory_space<vmem>>, %arg19: memref<2x8x32xf32, #tpu.memory_space<vmem>>) attributes {dimension_semantics = [#tpu.dimension_semantics<parallel>], iteration_bounds = array<i64: 1>, scalar_prefetch = 0 : i64, scratch_operands = 0 : i64, tpu.core_type = #tpu.core_type<tc>, window_params = [{transform_indices = @transform_0, window_bounds = array<i64: 2, 1, 8>}, {transform_indices = @transform_1, window_bounds = array<i64: 2, 8, 32>}, {pipeline_mode = #tpu.pipeline_mode<synchronous>, transform_indices = @transform_2, window_bounds = array<i64: 32, 32>}, {pipeline_mode = #tpu.pipeline_mode<synchronous>, transform_indices = @transform_3, window_bounds = array<i64: 1, 32>}, {pipeline_mode = #tpu.pipeline_mode<synchronous>, transform_indices = @transform_4, window_bounds = array<i64: 32, 32>}, {pipeline_mode = #tpu.pipeline_mode<synchronous>, transform_indices = @transform_5, window_bounds = array<i64: 1, 32>}, {pipeline_mode = #tpu.pipeline_mode<synchronous>, transform_indices = @transform_6, window_bounds = array<i64: 32, 32>}, {pipeline_mode = #tpu.pipeline_mode<synchronous>, transform_indices = @transform_7, window_bounds = array<i64: 1, 32>}, {pipeline_mode = #tpu.pipeline_mode<synchronous>, transform_indices = @transform_8, window_bounds = array<i64: 32, 32>}, {pipeline_mode = #tpu.pipeline_mode<synchronous>, transform_indices = @transform_9, window_bounds = array<i64: 1, 32>}, {pipeline_mode = #tpu.pipeline_mode<synchronous>, transform_indices = @transform_10, window_bounds = array<i64: 1, 32>}, {pipeline_mode = #tpu.pipeline_mode<synchronous>, transform_indices = @transform_11, window_bounds = array<i64: 1, 32>}, {pipeline_mode = #tpu.pipeline_mode<synchronous>, transform_indices = @transform_12, window_bounds = array<i64: 1, 32>}, {pipeline_mode = #tpu.pipeline_mode<synchronous>, transform_indices = @transform_13, window_bounds = array<i64: 1, 32>}, {pipeline_mode = #tpu.pipeline_mode<synchronous>, transform_indices = @transform_14, window_bounds = array<i64: 32, 64>}, {pipeline_mode = #tpu.pipeline_mode<synchronous>, transform_indices = @transform_15, window_bounds = array<i64: 1, 64>}, {pipeline_mode = #tpu.pipeline_mode<synchronous>, transform_indices = @transform_16, window_bounds = array<i64: 64, 32>}, {pipeline_mode = #tpu.pipeline_mode<synchronous>, transform_indices = @transform_17, window_bounds = array<i64: 1, 32>}, {transform_indices = @transform_18, window_bounds = array<i64: 2, 8, 32>}]} {
    %c0 = arith.constant 0 : index
    %c0_0 = arith.constant 0 : index
    %c0_1 = arith.constant 0 : index
    %0 = vector.load %arg2[%c0, %c0_0, %c0_1] : memref<2x8x32xf32, #tpu.memory_space<vmem>>, vector<2x8x32xf32>
    %1 = vector.shape_cast %0 : vector<2x8x32xf32> to vector<16x32xf32>
    %c0_2 = arith.constant 0 : index
    %c0_3 = arith.constant 0 : index
    %2 = vector.load %arg11[%c0_2, %c0_3] : memref<1x32xf32, #tpu.memory_space<vmem>>, vector<1x32xf32>
    %c0_4 = arith.constant 0 : index
    %c0_5 = arith.constant 0 : index
    %3 = vector.load %arg12[%c0_4, %c0_5] : memref<1x32xf32, #tpu.memory_space<vmem>>, vector<1x32xf32>
    %cst = arith.constant dense<0.000000e+00> : vector<16xf32>
    %4 = vector.multi_reduction <add>, %1, %cst [1] : vector<16x32xf32> to vector<16xf32>
    %5 = vector.shape_cast %4 : vector<16xf32> to vector<16x1xf32>
    %cst_6 = arith.constant 3.200000e+01 : f32
    %6 = vector.broadcast %cst_6 : f32 to vector<16x1xf32>
    %7 = arith.divf %5, %6 : vector<16x1xf32>
    %8 = vector.broadcast %7 : vector<16x1xf32> to vector<16x32xf32>
    %9 = arith.subf %1, %8 : vector<16x32xf32>
    %10 = arith.mulf %9, %9 : vector<16x32xf32>
    %cst_7 = arith.constant dense<0.000000e+00> : vector<16xf32>
    %11 = vector.multi_reduction <add>, %10, %cst_7 [1] : vector<16x32xf32> to vector<16xf32>
    %12 = vector.shape_cast %11 : vector<16xf32> to vector<16x1xf32>
    %cst_8 = arith.constant 3.200000e+01 : f32
    %13 = vector.broadcast %cst_8 : f32 to vector<16x1xf32>
    %14 = arith.divf %12, %13 : vector<16x1xf32>
    %15 = vector.broadcast %7 : vector<16x1xf32> to vector<16x32xf32>
    %16 = arith.subf %1, %15 : vector<16x32xf32>
    %cst_9 = arith.constant 9.99999974E-6 : f32
    %17 = vector.broadcast %cst_9 : f32 to vector<16x1xf32>
    %18 = arith.addf %14, %17 : vector<16x1xf32>
    %19 = math.rsqrt %18 : vector<16x1xf32>
    %20 = vector.broadcast %19 : vector<16x1xf32> to vector<16x32xf32>
    %21 = arith.mulf %16, %20 : vector<16x32xf32>
    %22 = vector.broadcast %2 : vector<1x32xf32> to vector<16x32xf32>
    %23 = arith.mulf %21, %22 : vector<16x32xf32>
    %24 = vector.broadcast %3 : vector<1x32xf32> to vector<16x32xf32>
    %25 = arith.addf %23, %24 : vector<16x32xf32>
    %c0_10 = arith.constant 0 : index
    %c0_11 = arith.constant 0 : index
    %26 = vector.load %arg3[%c0_10, %c0_11] : memref<32x32xf32, #tpu.memory_space<vmem>>, vector<32x32xf32>
    %cst_12 = arith.constant dense<0.000000e+00> : vector<16x32xf32>
    %27 = tpu.matmul %25, %26, %cst_12 {dimension_numbers = #tpu.dot_dimension_numbers<[1], [0], [0], [1], [0, 0, 1, 1], [], []>} : vector<16x32xf32>, vector<32x32xf32>, vector<16x32xf32> -> vector<16x32xf32>
    %c0_13 = arith.constant 0 : index
    %c0_14 = arith.constant 0 : index
    %28 = vector.load %arg4[%c0_13, %c0_14] : memref<1x32xf32, #tpu.memory_space<vmem>>, vector<1x32xf32>
    %29 = vector.broadcast %28 : vector<1x32xf32> to vector<16x32xf32>
    %30 = arith.addf %27, %29 : vector<16x32xf32>
    %c0_15 = arith.constant 0 : index
    %c0_16 = arith.constant 0 : index
    %31 = vector.load %arg5[%c0_15, %c0_16] : memref<32x32xf32, #tpu.memory_space<vmem>>, vector<32x32xf32>
    %cst_17 = arith.constant dense<0.000000e+00> : vector<16x32xf32>
    %32 = tpu.matmul %25, %31, %cst_17 {dimension_numbers = #tpu.dot_dimension_numbers<[1], [0], [0], [1], [0, 0, 1, 1], [], []>} : vector<16x32xf32>, vector<32x32xf32>, vector<16x32xf32> -> vector<16x32xf32>
    %c0_18 = arith.constant 0 : index
    %c0_19 = arith.constant 0 : index
    %33 = vector.load %arg6[%c0_18, %c0_19] : memref<1x32xf32, #tpu.memory_space<vmem>>, vector<1x32xf32>
    %34 = vector.broadcast %33 : vector<1x32xf32> to vector<16x32xf32>
    %35 = arith.addf %32, %34 : vector<16x32xf32>
    %c0_20 = arith.constant 0 : index
    %c0_21 = arith.constant 0 : index
    %36 = vector.load %arg7[%c0_20, %c0_21] : memref<32x32xf32, #tpu.memory_space<vmem>>, vector<32x32xf32>
    %cst_22 = arith.constant dense<0.000000e+00> : vector<16x32xf32>
    %37 = tpu.matmul %25, %36, %cst_22 {dimension_numbers = #tpu.dot_dimension_numbers<[1], [0], [0], [1], [0, 0, 1, 1], [], []>} : vector<16x32xf32>, vector<32x32xf32>, vector<16x32xf32> -> vector<16x32xf32>
    %c0_23 = arith.constant 0 : index
    %c0_24 = arith.constant 0 : index
    %38 = vector.load %arg8[%c0_23, %c0_24] : memref<1x32xf32, #tpu.memory_space<vmem>>, vector<1x32xf32>
    %39 = vector.broadcast %38 : vector<1x32xf32> to vector<16x32xf32>
    %40 = arith.addf %37, %39 : vector<16x32xf32>
    %41 = vector.shape_cast %30 : vector<16x32xf32> to vector<2x8x32xf32>
    %42 = vector.shape_cast %35 : vector<16x32xf32> to vector<2x8x32xf32>
    %43 = vector.shape_cast %40 : vector<16x32xf32> to vector<2x8x32xf32>
    %c0_25 = arith.constant 0 : index
    %c0_26 = arith.constant 0 : index
    %c0_27 = arith.constant 0 : index
    %44 = vector.load %arg1[%c0_25, %c0_26, %c0_27] : memref<2x1x8xf32, #tpu.memory_space<vmem>>, vector<2x1x8xf32>
    %cst_28 = arith.constant 0.000000e+00 : f32
    %45 = vector.broadcast %cst_28 : f32 to vector<2x1x8xf32>
    %46 = arith.cmpf ogt, %44, %45 : vector<2x1x8xf32>
    %cst_29 = arith.constant 0.000000e+00 : f32
    %cst_30 = arith.constant -1.000000e+09 : f32
    %47 = vector.broadcast %cst_29 : f32 to vector<2x1x8xf32>
    %48 = vector.broadcast %cst_30 : f32 to vector<2x1x8xf32>
    %49 = arith.select %46, %47, %48 : vector<2x1x8xi1>, vector<2x1x8xf32>
    %50 = vector.extract_strided_slice %41 {offsets = [0, 0, 0], sizes = [2, 8, 8], strides = [1, 1, 1]} : vector<2x8x32xf32> to vector<2x8x8xf32>
    %51 = vector.extract_strided_slice %42 {offsets = [0, 0, 0], sizes = [2, 8, 8], strides = [1, 1, 1]} : vector<2x8x32xf32> to vector<2x8x8xf32>
    %52 = vector.extract_strided_slice %43 {offsets = [0, 0, 0], sizes = [2, 8, 8], strides = [1, 1, 1]} : vector<2x8x32xf32> to vector<2x8x8xf32>
    %cst_31 = arith.constant dense<0.000000e+00> : vector<2x8x8xf32>
    %53 = tpu.matmul %50, %51, %cst_31 {dimension_numbers = #tpu.dot_dimension_numbers<[2], [2], [1], [1], [0, 0, 0, 1, 1, 1], [0], [0]>} : vector<2x8x8xf32>, vector<2x8x8xf32>, vector<2x8x8xf32> -> vector<2x8x8xf32>
    %cst_32 = arith.constant 0.353553385 : f32
    %54 = vector.broadcast %cst_32 : f32 to vector<2x8x8xf32>
    %55 = arith.mulf %53, %54 : vector<2x8x8xf32>
    %56 = vector.broadcast %49 : vector<2x1x8xf32> to vector<2x8x8xf32>
    %57 = arith.addf %55, %56 : vector<2x8x8xf32>
    %cst_33 = arith.constant dense<0xFF800000> : vector<2x8xf32>
    %58 = vector.multi_reduction <maximumf>, %57, %cst_33 [2] : vector<2x8x8xf32> to vector<2x8xf32>
    %59 = vector.shape_cast %58 : vector<2x8xf32> to vector<2x8x1xf32>
    %60 = vector.broadcast %59 : vector<2x8x1xf32> to vector<2x8x8xf32>
    %61 = arith.subf %57, %60 : vector<2x8x8xf32>
    %62 = math.exp %61 : vector<2x8x8xf32>
    %cst_34 = arith.constant dense<0.000000e+00> : vector<2x8xf32>
    %63 = vector.multi_reduction <add>, %62, %cst_34 [2] : vector<2x8x8xf32> to vector<2x8xf32>
    %64 = vector.shape_cast %63 : vector<2x8xf32> to vector<2x8x1xf32>
    %65 = vector.broadcast %64 : vector<2x8x1xf32> to vector<2x8x8xf32>
    %66 = arith.divf %62, %65 : vector<2x8x8xf32>
    %cst_35 = arith.constant dense<0.000000e+00> : vector<2x8x8xf32>
    %67 = tpu.matmul %66, %52, %cst_35 {dimension_numbers = #tpu.dot_dimension_numbers<[2], [1], [1], [2], [0, 0, 0, 1, 1, 2], [0], [0]>} : vector<2x8x8xf32>, vector<2x8x8xf32>, vector<2x8x8xf32> -> vector<2x8x8xf32>
    %68 = vector.extract_strided_slice %41 {offsets = [0, 0, 8], sizes = [2, 8, 8], strides = [1, 1, 1]} : vector<2x8x32xf32> to vector<2x8x8xf32>
    %69 = vector.extract_strided_slice %42 {offsets = [0, 0, 8], sizes = [2, 8, 8], strides = [1, 1, 1]} : vector<2x8x32xf32> to vector<2x8x8xf32>
    %70 = vector.extract_strided_slice %43 {offsets = [0, 0, 8], sizes = [2, 8, 8], strides = [1, 1, 1]} : vector<2x8x32xf32> to vector<2x8x8xf32>
    %cst_36 = arith.constant dense<0.000000e+00> : vector<2x8x8xf32>
    %71 = tpu.matmul %68, %69, %cst_36 {dimension_numbers = #tpu.dot_dimension_numbers<[2], [2], [1], [1], [0, 0, 0, 1, 1, 1], [0], [0]>} : vector<2x8x8xf32>, vector<2x8x8xf32>, vector<2x8x8xf32> -> vector<2x8x8xf32>
    %cst_37 = arith.constant 0.353553385 : f32
    %72 = vector.broadcast %cst_37 : f32 to vector<2x8x8xf32>
    %73 = arith.mulf %71, %72 : vector<2x8x8xf32>
    %74 = vector.broadcast %49 : vector<2x1x8xf32> to vector<2x8x8xf32>
    %75 = arith.addf %73, %74 : vector<2x8x8xf32>
    %cst_38 = arith.constant dense<0xFF800000> : vector<2x8xf32>
    %76 = vector.multi_reduction <maximumf>, %75, %cst_38 [2] : vector<2x8x8xf32> to vector<2x8xf32>
    %77 = vector.shape_cast %76 : vector<2x8xf32> to vector<2x8x1xf32>
    %78 = vector.broadcast %77 : vector<2x8x1xf32> to vector<2x8x8xf32>
    %79 = arith.subf %75, %78 : vector<2x8x8xf32>
    %80 = math.exp %79 : vector<2x8x8xf32>
    %cst_39 = arith.constant dense<0.000000e+00> : vector<2x8xf32>
    %81 = vector.multi_reduction <add>, %80, %cst_39 [2] : vector<2x8x8xf32> to vector<2x8xf32>
    %82 = vector.shape_cast %81 : vector<2x8xf32> to vector<2x8x1xf32>
    %83 = vector.broadcast %82 : vector<2x8x1xf32> to vector<2x8x8xf32>
    %84 = arith.divf %80, %83 : vector<2x8x8xf32>
    %cst_40 = arith.constant dense<0.000000e+00> : vector<2x8x8xf32>
    %85 = tpu.matmul %84, %70, %cst_40 {dimension_numbers = #tpu.dot_dimension_numbers<[2], [1], [1], [2], [0, 0, 0, 1, 1, 2], [0], [0]>} : vector<2x8x8xf32>, vector<2x8x8xf32>, vector<2x8x8xf32> -> vector<2x8x8xf32>
    %86 = vector.extract_strided_slice %41 {offsets = [0, 0, 16], sizes = [2, 8, 8], strides = [1, 1, 1]} : vector<2x8x32xf32> to vector<2x8x8xf32>
    %87 = vector.extract_strided_slice %42 {offsets = [0, 0, 16], sizes = [2, 8, 8], strides = [1, 1, 1]} : vector<2x8x32xf32> to vector<2x8x8xf32>
    %88 = vector.extract_strided_slice %43 {offsets = [0, 0, 16], sizes = [2, 8, 8], strides = [1, 1, 1]} : vector<2x8x32xf32> to vector<2x8x8xf32>
    %cst_41 = arith.constant dense<0.000000e+00> : vector<2x8x8xf32>
    %89 = tpu.matmul %86, %87, %cst_41 {dimension_numbers = #tpu.dot_dimension_numbers<[2], [2], [1], [1], [0, 0, 0, 1, 1, 1], [0], [0]>} : vector<2x8x8xf32>, vector<2x8x8xf32>, vector<2x8x8xf32> -> vector<2x8x8xf32>
    %cst_42 = arith.constant 0.353553385 : f32
    %90 = vector.broadcast %cst_42 : f32 to vector<2x8x8xf32>
    %91 = arith.mulf %89, %90 : vector<2x8x8xf32>
    %92 = vector.broadcast %49 : vector<2x1x8xf32> to vector<2x8x8xf32>
    %93 = arith.addf %91, %92 : vector<2x8x8xf32>
    %cst_43 = arith.constant dense<0xFF800000> : vector<2x8xf32>
    %94 = vector.multi_reduction <maximumf>, %93, %cst_43 [2] : vector<2x8x8xf32> to vector<2x8xf32>
    %95 = vector.shape_cast %94 : vector<2x8xf32> to vector<2x8x1xf32>
    %96 = vector.broadcast %95 : vector<2x8x1xf32> to vector<2x8x8xf32>
    %97 = arith.subf %93, %96 : vector<2x8x8xf32>
    %98 = math.exp %97 : vector<2x8x8xf32>
    %cst_44 = arith.constant dense<0.000000e+00> : vector<2x8xf32>
    %99 = vector.multi_reduction <add>, %98, %cst_44 [2] : vector<2x8x8xf32> to vector<2x8xf32>
    %100 = vector.shape_cast %99 : vector<2x8xf32> to vector<2x8x1xf32>
    %101 = vector.broadcast %100 : vector<2x8x1xf32> to vector<2x8x8xf32>
    %102 = arith.divf %98, %101 : vector<2x8x8xf32>
    %cst_45 = arith.constant dense<0.000000e+00> : vector<2x8x8xf32>
    %103 = tpu.matmul %102, %88, %cst_45 {dimension_numbers = #tpu.dot_dimension_numbers<[2], [1], [1], [2], [0, 0, 0, 1, 1, 2], [0], [0]>} : vector<2x8x8xf32>, vector<2x8x8xf32>, vector<2x8x8xf32> -> vector<2x8x8xf32>
    %104 = vector.extract_strided_slice %41 {offsets = [0, 0, 24], sizes = [2, 8, 8], strides = [1, 1, 1]} : vector<2x8x32xf32> to vector<2x8x8xf32>
    %105 = vector.extract_strided_slice %42 {offsets = [0, 0, 24], sizes = [2, 8, 8], strides = [1, 1, 1]} : vector<2x8x32xf32> to vector<2x8x8xf32>
    %106 = vector.extract_strided_slice %43 {offsets = [0, 0, 24], sizes = [2, 8, 8], strides = [1, 1, 1]} : vector<2x8x32xf32> to vector<2x8x8xf32>
    %cst_46 = arith.constant dense<0.000000e+00> : vector<2x8x8xf32>
    %107 = tpu.matmul %104, %105, %cst_46 {dimension_numbers = #tpu.dot_dimension_numbers<[2], [2], [1], [1], [0, 0, 0, 1, 1, 1], [0], [0]>} : vector<2x8x8xf32>, vector<2x8x8xf32>, vector<2x8x8xf32> -> vector<2x8x8xf32>
    %cst_47 = arith.constant 0.353553385 : f32
    %108 = vector.broadcast %cst_47 : f32 to vector<2x8x8xf32>
    %109 = arith.mulf %107, %108 : vector<2x8x8xf32>
    %110 = vector.broadcast %49 : vector<2x1x8xf32> to vector<2x8x8xf32>
    %111 = arith.addf %109, %110 : vector<2x8x8xf32>
    %cst_48 = arith.constant dense<0xFF800000> : vector<2x8xf32>
    %112 = vector.multi_reduction <maximumf>, %111, %cst_48 [2] : vector<2x8x8xf32> to vector<2x8xf32>
    %113 = vector.shape_cast %112 : vector<2x8xf32> to vector<2x8x1xf32>
    %114 = vector.broadcast %113 : vector<2x8x1xf32> to vector<2x8x8xf32>
    %115 = arith.subf %111, %114 : vector<2x8x8xf32>
    %116 = math.exp %115 : vector<2x8x8xf32>
    %cst_49 = arith.constant dense<0.000000e+00> : vector<2x8xf32>
    %117 = vector.multi_reduction <add>, %116, %cst_49 [2] : vector<2x8x8xf32> to vector<2x8xf32>
    %118 = vector.shape_cast %117 : vector<2x8xf32> to vector<2x8x1xf32>
    %119 = vector.broadcast %118 : vector<2x8x1xf32> to vector<2x8x8xf32>
    %120 = arith.divf %116, %119 : vector<2x8x8xf32>
    %cst_50 = arith.constant dense<0.000000e+00> : vector<2x8x8xf32>
    %121 = tpu.matmul %120, %106, %cst_50 {dimension_numbers = #tpu.dot_dimension_numbers<[2], [1], [1], [2], [0, 0, 0, 1, 1, 2], [0], [0]>} : vector<2x8x8xf32>, vector<2x8x8xf32>, vector<2x8x8xf32> -> vector<2x8x8xf32>
    %122 = tpu.concatenate %67, %85, %103, %121 in 2 : vector<2x8x8xf32>, vector<2x8x8xf32>, vector<2x8x8xf32>, vector<2x8x8xf32> -> vector<2x8x32xf32>
    %123 = vector.shape_cast %122 : vector<2x8x32xf32> to vector<16x32xf32>
    %c0_51 = arith.constant 0 : index
    %c0_52 = arith.constant 0 : index
    %124 = vector.load %arg9[%c0_51, %c0_52] : memref<32x32xf32, #tpu.memory_space<vmem>>, vector<32x32xf32>
    %cst_53 = arith.constant dense<0.000000e+00> : vector<16x32xf32>
    %125 = tpu.matmul %123, %124, %cst_53 {dimension_numbers = #tpu.dot_dimension_numbers<[1], [0], [0], [1], [0, 0, 1, 1], [], []>} : vector<16x32xf32>, vector<32x32xf32>, vector<16x32xf32> -> vector<16x32xf32>
    %c0_54 = arith.constant 0 : index
    %c0_55 = arith.constant 0 : index
    %126 = vector.load %arg10[%c0_54, %c0_55] : memref<1x32xf32, #tpu.memory_space<vmem>>, vector<1x32xf32>
    %127 = vector.broadcast %126 : vector<1x32xf32> to vector<16x32xf32>
    %128 = arith.addf %125, %127 : vector<16x32xf32>
    %129 = arith.addf %1, %128 : vector<16x32xf32>
    %c0_56 = arith.constant 0 : index
    %c0_57 = arith.constant 0 : index
    %130 = vector.load %arg13[%c0_56, %c0_57] : memref<1x32xf32, #tpu.memory_space<vmem>>, vector<1x32xf32>
    %c0_58 = arith.constant 0 : index
    %c0_59 = arith.constant 0 : index
    %131 = vector.load %arg14[%c0_58, %c0_59] : memref<1x32xf32, #tpu.memory_space<vmem>>, vector<1x32xf32>
    %cst_60 = arith.constant dense<0.000000e+00> : vector<16xf32>
    %132 = vector.multi_reduction <add>, %129, %cst_60 [1] : vector<16x32xf32> to vector<16xf32>
    %133 = vector.shape_cast %132 : vector<16xf32> to vector<16x1xf32>
    %cst_61 = arith.constant 3.200000e+01 : f32
    %134 = vector.broadcast %cst_61 : f32 to vector<16x1xf32>
    %135 = arith.divf %133, %134 : vector<16x1xf32>
    %136 = vector.broadcast %135 : vector<16x1xf32> to vector<16x32xf32>
    %137 = arith.subf %129, %136 : vector<16x32xf32>
    %138 = arith.mulf %137, %137 : vector<16x32xf32>
    %cst_62 = arith.constant dense<0.000000e+00> : vector<16xf32>
    %139 = vector.multi_reduction <add>, %138, %cst_62 [1] : vector<16x32xf32> to vector<16xf32>
    %140 = vector.shape_cast %139 : vector<16xf32> to vector<16x1xf32>
    %cst_63 = arith.constant 3.200000e+01 : f32
    %141 = vector.broadcast %cst_63 : f32 to vector<16x1xf32>
    %142 = arith.divf %140, %141 : vector<16x1xf32>
    %143 = vector.broadcast %135 : vector<16x1xf32> to vector<16x32xf32>
    %144 = arith.subf %129, %143 : vector<16x32xf32>
    %cst_64 = arith.constant 9.99999974E-6 : f32
    %145 = vector.broadcast %cst_64 : f32 to vector<16x1xf32>
    %146 = arith.addf %142, %145 : vector<16x1xf32>
    %147 = math.rsqrt %146 : vector<16x1xf32>
    %148 = vector.broadcast %147 : vector<16x1xf32> to vector<16x32xf32>
    %149 = arith.mulf %144, %148 : vector<16x32xf32>
    %150 = vector.broadcast %130 : vector<1x32xf32> to vector<16x32xf32>
    %151 = arith.mulf %149, %150 : vector<16x32xf32>
    %152 = vector.broadcast %131 : vector<1x32xf32> to vector<16x32xf32>
    %153 = arith.addf %151, %152 : vector<16x32xf32>
    %c0_65 = arith.constant 0 : index
    %c0_66 = arith.constant 0 : index
    %154 = vector.load %arg15[%c0_65, %c0_66] : memref<32x64xf32, #tpu.memory_space<vmem>>, vector<32x64xf32>
    %cst_67 = arith.constant dense<0.000000e+00> : vector<16x64xf32>
    %155 = tpu.matmul %153, %154, %cst_67 {dimension_numbers = #tpu.dot_dimension_numbers<[1], [0], [0], [1], [0, 0, 1, 1], [], []>} : vector<16x32xf32>, vector<32x64xf32>, vector<16x64xf32> -> vector<16x64xf32>
    %c0_68 = arith.constant 0 : index
    %c0_69 = arith.constant 0 : index
    %156 = vector.load %arg16[%c0_68, %c0_69] : memref<1x64xf32, #tpu.memory_space<vmem>>, vector<1x64xf32>
    %157 = vector.broadcast %156 : vector<1x64xf32> to vector<16x64xf32>
    %158 = arith.addf %155, %157 : vector<16x64xf32>
    %cst_70 = arith.constant 0.000000e+00 : f32
    %159 = vector.broadcast %cst_70 : f32 to vector<16x64xf32>
    %160 = arith.maximumf %158, %159 : vector<16x64xf32>
    %c0_71 = arith.constant 0 : index
    %c0_72 = arith.constant 0 : index
    %161 = vector.load %arg17[%c0_71, %c0_72] : memref<64x32xf32, #tpu.memory_space<vmem>>, vector<64x32xf32>
    %cst_73 = arith.constant dense<0.000000e+00> : vector<16x32xf32>
    %162 = tpu.matmul %160, %161, %cst_73 {dimension_numbers = #tpu.dot_dimension_numbers<[1], [0], [0], [1], [0, 0, 1, 1], [], []>} : vector<16x64xf32>, vector<64x32xf32>, vector<16x32xf32> -> vector<16x32xf32>
    %c0_74 = arith.constant 0 : index
    %c0_75 = arith.constant 0 : index
    %163 = vector.load %arg18[%c0_74, %c0_75] : memref<1x32xf32, #tpu.memory_space<vmem>>, vector<1x32xf32>
    %164 = vector.broadcast %163 : vector<1x32xf32> to vector<16x32xf32>
    %165 = arith.addf %162, %164 : vector<16x32xf32>
    %166 = arith.addf %129, %165 : vector<16x32xf32>
    %167 = vector.shape_cast %166 : vector<16x32xf32> to vector<2x8x32xf32>
    %c0_76 = arith.constant 0 : index
    %c0_77 = arith.constant 0 : index
    %c0_78 = arith.constant 0 : index
    %168 = vector.load %arg19[%c0_76, %c0_77, %c0_78] : memref<2x8x32xf32, #tpu.memory_space<vmem>>, vector<2x8x32xf32>
    tpu.vector_store %arg19[%c0_76, %c0_77, %c0_78], %167 {strides = array<i32>} : memref<2x8x32xf32, #tpu.memory_space<vmem>>, vector<2x8x32xf32>,
    return
  }
  func.func @transform_0(%arg0: i32) -> (i32, i32, i32) {
    %c0_i32 = arith.constant 0 : i32
    %c0_i32_0 = arith.constant 0 : i32
    %c0_i32_1 = arith.constant 0 : i32
    return %arg0, %c0_i32, %c0_i32_0 : i32, i32, i32
  }
  func.func @transform_1(%arg0: i32) -> (i32, i32, i32) {
    %c0_i32 = arith.constant 0 : i32
    %c0_i32_0 = arith.constant 0 : i32
    %c0_i32_1 = arith.constant 0 : i32
    return %arg0, %c0_i32, %c0_i32_0 : i32, i32, i32
  }
  func.func @transform_2(%arg0: i32) -> (i32, i32) {
    %c0_i32 = arith.constant 0 : i32
    %c0_i32_0 = arith.constant 0 : i32
    %c0_i32_1 = arith.constant 0 : i32
    return %c0_i32, %c0_i32_0 : i32, i32
  }
  func.func @transform_3(%arg0: i32) -> (i32, i32) {
    %c0_i32 = arith.constant 0 : i32
    %c0_i32_0 = arith.constant 0 : i32
    %c0_i32_1 = arith.constant 0 : i32
    return %c0_i32, %c0_i32_0 : i32, i32
  }
  func.func @transform_4(%arg0: i32) -> (i32, i32) {
    %c0_i32 = arith.constant 0 : i32
    %c0_i32_0 = arith.constant 0 : i32
    %c0_i32_1 = arith.constant 0 : i32
    return %c0_i32, %c0_i32_0 : i32, i32
  }
  func.func @transform_5(%arg0: i32) -> (i32, i32) {
    %c0_i32 = arith.constant 0 : i32
    %c0_i32_0 = arith.constant 0 : i32
    %c0_i32_1 = arith.constant 0 : i32
    return %c0_i32, %c0_i32_0 : i32, i32
  }
  func.func @transform_6(%arg0: i32) -> (i32, i32) {
    %c0_i32 = arith.constant 0 : i32
    %c0_i32_0 = arith.constant 0 : i32
    %c0_i32_1 = arith.constant 0 : i32
    return %c0_i32, %c0_i32_0 : i32, i32
  }
  func.func @transform_7(%arg0: i32) -> (i32, i32) {
    %c0_i32 = arith.constant 0 : i32
    %c0_i32_0 = arith.constant 0 : i32
    %c0_i32_1 = arith.constant 0 : i32
    return %c0_i32, %c0_i32_0 : i32, i32
  }
  func.func @transform_8(%arg0: i32) -> (i32, i32) {
    %c0_i32 = arith.constant 0 : i32
    %c0_i32_0 = arith.constant 0 : i32
    %c0_i32_1 = arith.constant 0 : i32
    return %c0_i32, %c0_i32_0 : i32, i32
  }
  func.func @transform_9(%arg0: i32) -> (i32, i32) {
    %c0_i32 = arith.constant 0 : i32
    %c0_i32_0 = arith.constant 0 : i32
    %c0_i32_1 = arith.constant 0 : i32
    return %c0_i32, %c0_i32_0 : i32, i32
  }
  func.func @transform_10(%arg0: i32) -> (i32, i32) {
    %c0_i32 = arith.constant 0 : i32
    %c0_i32_0 = arith.constant 0 : i32
    %c0_i32_1 = arith.constant 0 : i32
    return %c0_i32, %c0_i32_0 : i32, i32
  }
  func.func @transform_11(%arg0: i32) -> (i32, i32) {
    %c0_i32 = arith.constant 0 : i32
    %c0_i32_0 = arith.constant 0 : i32
    %c0_i32_1 = arith.constant 0 : i32
    return %c0_i32, %c0_i32_0 : i32, i32
  }
  func.func @transform_12(%arg0: i32) -> (i32, i32) {
    %c0_i32 = arith.constant 0 : i32
    %c0_i32_0 = arith.constant 0 : i32
    %c0_i32_1 = arith.constant 0 : i32
    return %c0_i32, %c0_i32_0 : i32, i32
  }
  func.func @transform_13(%arg0: i32) -> (i32, i32) {
    %c0_i32 = arith.constant 0 : i32
    %c0_i32_0 = arith.constant 0 : i32
    %c0_i32_1 = arith.constant 0 : i32
    return %c0_i32, %c0_i32_0 : i32, i32
  }
  func.func @transform_14(%arg0: i32) -> (i32, i32) {
    %c0_i32 = arith.constant 0 : i32
    %c0_i32_0 = arith.constant 0 : i32
    %c0_i32_1 = arith.constant 0 : i32
    return %c0_i32, %c0_i32_0 : i32, i32
  }
  func.func @transform_15(%arg0: i32) -> (i32, i32) {
    %c0_i32 = arith.constant 0 : i32
    %c0_i32_0 = arith.constant 0 : i32
    %c0_i32_1 = arith.constant 0 : i32
    return %c0_i32, %c0_i32_0 : i32, i32
  }
  func.func @transform_16(%arg0: i32) -> (i32, i32) {
    %c0_i32 = arith.constant 0 : i32
    %c0_i32_0 = arith.constant 0 : i32
    %c0_i32_1 = arith.constant 0 : i32
    return %c0_i32, %c0_i32_0 : i32, i32
  }
  func.func @transform_17(%arg0: i32) -> (i32, i32) {
    %c0_i32 = arith.constant 0 : i32
    %c0_i32_0 = arith.constant 0 : i32
    %c0_i32_1 = arith.constant 0 : i32
    return %c0_i32, %c0_i32_0 : i32, i32
  }
  func.func @transform_18(%arg0: i32) -> (i32, i32, i32) {
    %c0_i32 = arith.constant 0 : i32
    %c0_i32_0 = arith.constant 0 : i32
    %c0_i32_1 = arith.constant 0 : i32
    return %arg0, %c0_i32, %c0_i32_0 : i32, i32, i32
  }
}

</mosaic_0001>

<bundles_post_ra>
// kernel: tpu_custom_call.1
= control target key start
LH: loop header
LB: loop body
LE: loop exit
PB: predicated region body
PF: predicated region fallthrough
CT: control target
= control target key end

     0   :  { %s3154_s0 = inlined_call_operand.hbm [shape: f32[2,1,8], index: 0, kind: input, shape index: {}]   ;;  %s3155_s1 = inlined_call_operand.hbm [shape: f32[2,8,32], index: 1, kind: input, shape index: {}]   ;;  %s3156_s2 = inlined_call_operand.vmem [shape: f32[32,32], index: 2, kind: input, shape index: {}]   ;;  %s3157_s3 = inlined_call_operand.vmem [shape: f32[1,32], index: 3, kind: input, shape index: {}]   ;;  %s3158_s4 = inlined_call_operand.vmem [shape: f32[32,32], index: 4, kind: input, shape index: {}]   ;;  %s3159_s5 = inlined_call_operand.vmem [shape: f32[1,32], index: 5, kind: input, shape index: {}]   ;;  %s3160_s6 = inlined_call_operand.vmem [shape: f32[32,32], index: 6, kind: input, shape index: {}]   ;;  %s3161_s7 = inlined_call_operand.vmem [shape: f32[1,32], index: 7, kind: input, shape index: {}]   ;;  %s3162_s8 = inlined_call_operand.hbm [shape: f32[32,32], index: 8, kind: input, shape index: {}]   ;;  %s3163_s9 = inlined_call_operand.vmem [shape: f32[1,32], index: 9, kind: input, shape index: {}]   ;;  %s3164_s10 = inlined_call_operand.vmem [shape: f32[1,32], index: 10, kind: input, shape index: {}]   ;;  %s3165_s11 = inlined_call_operand.vmem [shape: f32[1,32], index: 11, kind: input, shape index: {}]   ;;  %s3166_s12 = inlined_call_operand.vmem [shape: f32[1,32], index: 12, kind: input, shape index: {}]   ;;  %s3167_s13 = inlined_call_operand.vmem [shape: f32[1,32], index: 13, kind: input, shape index: {}]   ;;  %s3168_s14 = inlined_call_operand.hbm [shape: f32[32,64], index: 14, kind: input, shape index: {}]   ;;  %s3169_s15 = inlined_call_operand.vmem [shape: f32[1,64], index: 15, kind: input, shape index: {}]   ;;  %s3170_s16 = inlined_call_operand.vmem [shape: f32[64,32], index: 16, kind: input, shape index: {}]   ;;  %s3171_s17 = inlined_call_operand.vmem [shape: f32[1,32], index: 17, kind: input, shape index: {}]   ;;  %s3172_s18 = inlined_call_operand.hbm [shape: f32[2,8,32], index: 18, kind: output, shape index: {}]  }
   0x1   :  { %3181 = sst [smem:[#allocation15_spill]] %s3154_s0 }
   0x2   :  { %3182 = sst [smem:[#allocation16_spill]] %s3155_s1 }
   0x3   :  { %3183 = sst [smem:[#allocation17_spill]] %s3156_s2 }
   0x4   :  { %3184 = sst [smem:[#allocation18_spill]] %s3171_s17 }
   0x5   :  { %3185 = sst [smem:[#allocation19_spill]] %s3172_s18 }
   0x6   :  { %23 = vsyncpa [#allocation3], 0 }
   0x7   :  { %24 = vsyncpa [#allocation6], 0 }
   0x8   :  { %25 = vsyncpa [#allocation9], 0 }
   0x9   :  { %26 = vsyncpa [#allocation4], 0  ;;  %s2660_s27 = smov [#allocation5]   ;;  %s3186_s0 = sld [smem:[#allocation16_spill]] }
   0xa   :  { %s44_s28 = sshll.u32 %s2660_s27, 4  ;;  %s45_s28 = int_to_ptr.vmem [resolvable:$true] %s44_s28 }
   0xf   :  { %s2542_s19 = scalar_lea.hbm %s3186_s0, 256 }
  0x10   :  { %p2543_p0 = scmp.ne.s32.totalorder %s3186_s0, %s2542_s19  ;;  %p2546_p1 = scmp.lt.u32.totalorder %s2542_s19, %s3186_s0 }
  0x12   :  { %p2548_p2 = pnand %p2546_p1, %p2543_p0 }
  0x14   :  { %2551 = shalt.err (!%p2548_p2)
}
  0x15   :  { %s2552_s2 = scalar_lea.vmem %s45_s28, 256  ;;  %p2557_p4 = scmp.lt.s32.totalorder %s45_s28, %s45_s28 }
  0x16   :  { %p2553_p3 = scmp.ne.s32.totalorder %s45_s28, %s2552_s2  ;;  %p2558_p5 = scmp.lt.s32.totalorder %s2552_s2, %s2552_s2 }
  0x18   :  { %p2559_p6 = por %p2558_p5, %p2557_p4 }
  0x1a   :  { %p2560_p7 = pnand %p2559_p6, %p2553_p3 }
  0x1c   :  { %2563 = shalt.err (!%p2560_p7)
}
  0x1d   :  { %s3177_s23 = smov 128   ;;  %s3179_s24 = smov 8  }
  0x1e   :  { %50 = dma.hbm_to_vmem [thread:$0]  %s3186_s0, 256, %s45_s28, [#allocation6], %s3177_s23, %s3177_s23, %s3179_s24  }
  0x1f   :  { %s2663_s27 = smov [#allocation2]   ;;  %s3187_s1 = sld [smem:[#allocation15_spill]] }
  0x20   :  { %s32_s29 = sshll.u32 %s2663_s27, 4  ;;  %s33_s29 = int_to_ptr.vmem [resolvable:$true] %s32_s29 }
  0x25   :  { %s2564_s20 = scalar_lea.hbm %s3187_s1, 32 }
  0x26   :  { %p2565_p8 = scmp.ne.s32.totalorder %s3187_s1, %s2564_s20  ;;  %p2568_p9 = scmp.lt.u32.totalorder %s2564_s20, %s3187_s1 }
  0x28   :  { %p2570_p10 = pnand %p2568_p9, %p2565_p8 }
  0x2a   :  { %2573 = shalt.err (!%p2570_p10)
}
  0x2b   :  { %s2574_s17 = scalar_lea.vmem %s33_s29, 32  ;;  %p2579_p12 = scmp.lt.s32.totalorder %s33_s29, %s33_s29 }
  0x2c   :  { %p2575_p11 = scmp.ne.s32.totalorder %s33_s29, %s2574_s17  ;;  %p2580_p13 = scmp.lt.s32.totalorder %s2574_s17, %s2574_s17 }
  0x2e   :  { %p2581_p0 = por %p2580_p13, %p2579_p12 }
  0x30   :  { %p2582_p1 = pnand %p2581_p0, %p2575_p11 }
  0x32   :  { %2585 = shalt.err (!%p2582_p1)
}
  0x33   :  { %s2664_s28 = smov 16   ;;  %s2665_s0 = smov 1  }
  0x34   :  { %38 = dma.hbm_to_vmem [thread:$0]  %s3187_s1, 32, %s33_s29, [#allocation3], %s2664_s28, %s2664_s28, %s2665_s0  }
  0x35   :  { %s2666_s27 = smov [#allocation7]   ;;  %s2667_s30 = smov [#allocation8]  }
  0x36   :  { %s68_s18 = sshll.u32 %s2666_s27, 4  ;;  %s90_s19 = sshll.u32 %s2667_s30, 4  ;;  %s69_s18 = int_to_ptr.vmem [resolvable:$true] %s68_s18  ;;  %s2800_s19 = int_to_ptr.vmem [resolvable:$true] %s90_s19 }
  0x37   :  { %s2586_s21 = scalar_lea.hbm %s3162_s8, 512 }
  0x38   :  { %p2587_p2 = scmp.ne.s32.totalorder %s3162_s8, %s2586_s21  ;;  %p2590_p3 = scmp.lt.u32.totalorder %s2586_s21, %s3162_s8 }
  0x3a   :  { %p2592_p4 = pnand %p2590_p3, %p2587_p2 }
  0x3c   :  { %2595 = shalt.err (!%p2592_p4)
}
  0x3d   :  { %s2596_s29 = scalar_lea.vmem %s69_s18, 512  ;;  %p2601_p6 = scmp.lt.s32.totalorder %s69_s18, %s69_s18 }
  0x3e   :  { %p2597_p5 = scmp.ne.s32.totalorder %s69_s18, %s2596_s29  ;;  %p2602_p7 = scmp.lt.s32.totalorder %s2596_s29, %s2596_s29 }
  0x40   :  { %p2603_p8 = por %p2602_p7, %p2601_p6 }
  0x42   :  { %p2604_p9 = pnand %p2603_p8, %p2597_p5 }
  0x44   :  { %2607 = shalt.err (!%p2604_p9)
}
  0x45   :  { %s3188_s1 = smov 8   ;;  %s3189_s0 = smov 128  }
  0x46   :  { %74 = dma.hbm_to_vmem [thread:$0]  %s3162_s8, 512, %s69_s18, [#allocation6], %s3189_s0, %s3189_s0, %s3188_s1  }
  0x47   :  { %s2608_s23 = scalar_lea.hbm %s3168_s14, 512 }
  0x48   :  { %p2609_p10 = scmp.ne.s32.totalorder %s3168_s14, %s2608_s23  ;;  %p2612_p11 = scmp.lt.u32.totalorder %s2608_s23, %s3168_s14 }
  0x4a   :  { %p2614_p12 = pnand %p2612_p11, %p2609_p10 }
  0x4c   :  { %2617 = shalt.err (!%p2614_p12)
}
  0x4d   :  { %s2618_s22 = scalar_lea.vmem %s2800_s19, 512  ;;  %p2623_p0 = scmp.lt.s32.totalorder %s2800_s19, %s2800_s19 }
  0x4e   :  { %p2619_p13 = scmp.ne.s32.totalorder %s2800_s19, %s2618_s22  ;;  %p2624_p1 = scmp.lt.s32.totalorder %s2618_s22, %s2618_s22 }
  0x50   :  { %p2625_p2 = por %p2624_p1, %p2623_p0 }
  0x52   :  { %p2626_p3 = pnand %p2625_p2, %p2619_p13 }
  0x54   :  { %2629 = shalt.err (!%p2626_p3)
}
  0x55   :  { %96 = dma.hbm_to_vmem [thread:$0]  %s3168_s14, 512, %s2800_s19, [#allocation9], %s3189_s0, %s3189_s0, %s3188_s1  }
  0x56   :  { %2652 = dma.done.wait [#allocation3], 32  }
  0x57   :  { %2653 = vsyncadd [#allocation3], 4294967264 }
  0x58   :  { %2654 = dma.done.wait [#allocation6], 768  }
  0x59   :  { %2655 = vsyncadd [#allocation6], 4294966528 }
  0x5a   :  { %2656 = dma.done.wait [#allocation9], 512  }
  0x5b   :  { %2657 = vsyncadd [#allocation9], 4294966784  ;;  %vm119_vm0 = vcmask 261120   ;;  %v2837_v0 = vld [vmem:[#allocation5] sm:$0xff]  ;;  %v2839_v1 = vld [vmem:[#allocation5 + $0x8] sm:$0xff]  ;;  %s3190_s2 = sld [smem:[#allocation17_spill]] }
  0x5c   :  { %v120_v2 = vsel %vm119_vm0, %v2837_v0, 0.0  ;;  %v123_v3 = vsel %vm119_vm0, %v2839_v1, 0.0  ;;  %v341_v16 = vld [vmem:[%s3160_s6] sm:$0xff]  ;;  %v342_v18 = vld [vmem:[%s3160_s6 + $0x8] sm:$0xff]  ;;  %v343_v23 = vld [vmem:[%s3160_s6 + $0x10] sm:$0xff]  ;;  %v2668_v48 = vmov 0.0  }
  0x5d   :  { %121 = vadd.xlane.f32.xlu0 %v120_v2  ;;  %v2446_v21 = vpack.c.bf16 %v342_v18, %v341_v16  ;;  %v344_v24 = vld [vmem:[%s3160_s6 + $0x18] sm:$0xff]  ;;  %v255_v26 = vld [vmem:[%s3158_s4] sm:$0xff]  ;;  %v256_v27 = vld [vmem:[%s3158_s4 + $0x8] sm:$0xff]  ;;  %vm2669_vm1 = vmmov 0   ;;  %vm433_vm2 = vcmask 64512   ;;  %v590_v2 = vlaneseq }
  0x5e   :  { %v2450_v25 = vpack.c.bf16 %v344_v24, %v343_v23  ;;  %v2438_v28 = vpack.c.bf16 %v256_v27, %v255_v26  ;;  %v2158_v36 = vld [vmem:[%s3164_s10] ss:$0 sm:$0xff]  ;;  %v257_v43 = vld [vmem:[%s3158_s4 + $0x10] sm:$0xff]  ;;  %v258_v44 = vld [vmem:[%s3158_s4 + $0x18] sm:$0xff]  ;;  %vm1803_vm5 = vcmask 195584   ;;  %vm1800_vm6 = vcmask 130048  }
  0x5f   :  { %2447 = vmatprep.subr.bf16.mxu0 %v2446_v21  ;;  %v2159_v38 = vld [vmem:[%s3165_s11] ss:$0 sm:$0xff]  ;;  %v2442_v47 = vpack.c.bf16 %v258_v44, %v257_v43  ;;  %vm2053_vm7 = vcmask 523264  }
  0x60   :  { %2449 = vmatpush3.bf16.msra.mxu0 %v2446_v21  ;;  %v2166_v49 = vld [vmem:[%s3161_s7] ss:$0 sm:$0xff]  ;;  %s2673_s7 = smov 104  }
  0x61   :  { %124 = vadd.xlane.f32.xlu0 %v123_v3  ;;  %v163_v14 = vld [vmem:[%s3190_s2] sm:$0xff]  ;;  %v164_v15 = vld [vmem:[%s3190_s2 + $0x8] sm:$0xff]  ;;  %v165_v19 = vld [vmem:[%s3190_s2 + $0x10] sm:$0xff]  ;;  %2451 = vmatprep.subr.bf16.mxu0 %v2450_v25 }
  0x62   :  { %v2430_v17 = vpack.c.bf16 %v164_v15, %v163_v14  ;;  %v166_v20 = vld [vmem:[%s3190_s2 + $0x18] sm:$0xff]  ;;  %v2163_v55 = vld [vmem:[%s3159_s5] ss:$0 sm:$0xff]  ;;  %s2672_s5 = smov 112  }
  0x63   :  { %v2434_v22 = vpack.c.bf16 %v166_v20, %v165_v19  ;;  %v2160_v58 = vld [vmem:[%s3157_s3] ss:$0 sm:$0xff]  ;;  %s2671_s3 = smov 120  }
  0x64   :  { %2431 = vmatprep.subr.bf16.mxu1 %v2430_v17  ;;  %2453 = vmatpush3.bf16.msra.mxu0 %v2450_v25  ;;  %v427_v3 = vld [vmem:[#allocation2] sm:$0x1] }
  0x65   :  { %2433 = vmatpush3.bf16.msra.mxu1 %v2430_v17  ;;  %2319 = vmatprep.subr.mxu0 %v2668_v48  ;;  %vm429_vm3 = vcmp.gt.f32.partialorder %v427_v3, 0.0 }
  0x66   :  { %2435 = vmatprep.subr.bf16.mxu1 %v2434_v22 }
  0x69   :  { %2437 = vmatpush3.bf16.msra.mxu1 %v2434_v22 }
  0x6a   :  { %2439 = vmatprep.subr.bf16.mxu1 %v2438_v28 }
  0xea   :  { %v122_v4 = vpop.xlane.xlu0 %121 }
  0xeb   :  { %v127_v5 = vmul.f32 0.03125, %v122_v4  ;;  %v591_v4 = vshrl.u32 %v590_v2, 7 }
  0xed   :  { %v129_v6 = vsub.f32 %v2837_v0, %v127_v5  ;;  %v428_v5 = vld [vmem:[#allocation2 + $0x1] sm:$0x1] }
  0xee   :  { %v125_v7 = vpop.xlane.xlu0 %124  ;;  %vm430_vm4 = vcmp.gt.f32.partialorder %v428_v5, 0.0 }
  0xef   :  { %v128_v8 = vmul.f32 0.03125, %v125_v7  ;;  %v131_v9 = vmul.f32 %v129_v6, %v129_v6  ;;  %v2670_v7 = vmov -1e+09  }
  0xf1   :  { %v130_v10 = vsub.f32 %v2839_v1, %v128_v8  ;;  %v133_v11 = vsel %vm119_vm0, %v131_v9, 0.0  ;;  %v431_v8 = vsel %vm429_vm3, 0.0, %v2670_v7 }
  0xf2   :  { %134 = vadd.xlane.f32.xlu1 %v133_v11  ;;  %v432_v11 = vsel %vm430_vm4, 0.0, %v2670_v7 }
  0xf3   :  { %v132_v12 = vmul.f32 %v130_v10, %v130_v10 }
  0xf5   :  { %v136_v13 = vsel %vm119_vm0, %v132_v12, 0.0 }
  0xf6   :  { %137 = vadd.xlane.f32.xlu1 %v136_v13 }
 0x17f   :  { %v135_v29 = vpop.xlane.xlu1 %134 }
 0x180   :  { %v139_v30 = vmul.f32 0.03125, %v135_v29 }
 0x182   :  { %v141_v31 = vadd.f32 1e-05, %v139_v30 }
 0x183   :  { %v138_v32 = vpop.xlane.xlu1 %137 }
 0x184   :  { %2502 = vrsqrt.f32 %v141_v31  ;;  %v140_v33 = vmul.f32 0.03125, %v138_v32 }
 0x186   :  { %v142_v34 = vadd.f32 1e-05, %v140_v33 }
 0x188   :  { %2504 = vrsqrt.f32 %v142_v34 }
 0x18e   :  { %v2503_v35 = vpop.eup %2502 }
 0x18f   :  { %v145_v37 = vmul.f32 %v2503_v35, %v129_v6  ;;  %v592_v6 = vsub.s32 0, %v591_v4 }
 0x191   :  { %v153_v39 = vmul.f32 %v2158_v36, %v145_v37  ;;  %v2942_v9 = vrot.slane %v431_v8, %v592_v6  ;;  %v2945_v15 = vrot.slane %v432_v11, %v592_v6 }
 0x192   :  { %v2505_v40 = vpop.eup %2504 }
 0x193   :  { %v146_v41 = vmul.f32 %v2505_v40, %v130_v10  ;;  %v161_v42 = vadd.f32 %v2159_v38, %v153_v39 }
 0x195   :  { %v154_v45 = vmul.f32 %v2158_v36, %v146_v41  ;;  %2284 = vmatprep.mubr.msk.f32.mxu1 %vm119_vm0, %v161_v42  ;;  %2306 = vmatprep.mubr.msk.f32.mxu0 %vm119_vm0, %v161_v42 }
 0x197   :  { %v162_v46 = vadd.f32 %v2159_v38, %v154_v45 }
 0x199   :  { %2285 = vmatmul.mubr.msk.f32.vlgmr.msra.gmra.mrb[0].mxu1 %vm119_vm0, %v162_v46  ;;  %2307 = vmatmul.mubr.msk.f32.vlgmr.msra.gmra.mrb[0].mxu0 %vm119_vm0, %v162_v46 }
 0x19a   :  { %2441 = vmatpush3.bf16.msra.mxu1 %v2438_v28  ;;  %2295 = vmatprep.mubr.msk.f32.mxu1 %vm119_vm0, %v161_v42 }
 0x19b   :  { %2443 = vmatprep.subr.bf16.mxu1 %v2442_v47  ;;  %2321 = vmatprep.mubr.msk.f32.mxu0 %vm2669_vm1, %v2668_v48 }
 0x19e   :  { %2445 = vmatpush3.bf16.msra.mxu1 %v2442_v47 }
 0x19f   :  { %2309 = vmatprep.subr.mxu1 %v2668_v48 }
 0x1a1   :  { %2296 = vmatmul.mubr.msk.f32.vlgmr.msra.gmra.mrb[2].mxu1 %vm119_vm0, %v162_v46 }
 0x1a2   :  { %2311 = vmatprep.mubr.msk.f32.mxu1 %vm2669_vm1, %v2668_v48 }
 0x26c   :  { %v2286_v50 = vpop.f32.mrb[0].mxu1  ;;  %v2308_v51 = vpop.f32.mrb[0].mxu0 }
 0x26d   :  { %v246_v52 = vpop.f32.mrb[1].mxu1  ;;  %v418_v53 = vpop.f32.mrb[1].mxu0  ;;  %v2931_v62 = vadd.f32 %v2286_v50, %v2160_v58  ;;  %v2934_v63 = vadd.f32 %v2308_v51, %v2166_v49 }
 0x26e   :  { %v2906_v54 = vadd.f32 %v2166_v49, %v418_v53  ;;  %v2920_v60 = vadd.f32 %v2160_v58, %v246_v52 }
 0x270   :  { %2320 = vmatpush3.msra.mxu0 %v2906_v54 }
 0x271   :  { %2329 = vmatprep.subr.mxu0 %v2668_v48 }
 0x274   :  { %v2297_v56 = vpop.f32.mrb[2].mxu1 }
 0x275   :  { %v332_v57 = vpop.f32.mrb[3].mxu1  ;;  %v2923_v61 = vadd.f32 %v2297_v56, %v2163_v55 }
 0x276   :  { %v2916_v59 = vadd.f32 %v2163_v55, %v332_v57 }
 0x278   :  { %2310 = vmatpush3.xpose.msk.msra.mxu1 %vm433_vm2, %v2916_v59 }
 0x279   :  { %2314 = vmatprep.subr.mxu1 %v2668_v48 }
 0x27b   :  { %2312 = vmatmul.mubr.msk.f32.vlgmr.msra.gmra.mrb[4].mxu1 %vm433_vm2, %v2920_v60 }
 0x27c   :  { %2315 = vmatpush3.xpose.msk.msra.mxu1 %vm433_vm2, %v2923_v61  ;;  %2316 = vmatprep.mubr.msk.f32.mxu1 %vm2669_vm1, %v2668_v48 }
 0x27d   :  { %2324 = vmatprep.subr.mxu1 %v2668_v48 }
 0x27f   :  { %2317 = vmatmul.mubr.msk.f32.vlgmr.msra.gmra.mrb[6].mxu1 %vm433_vm2, %v2931_v62 }
 0x280   :  { %2325 = vmatpush3.msra.mxu1 %v2934_v63  ;;  %2326 = vmatprep.mubr.msk.f32.mxu1 %vm2669_vm1, %v2668_v48 }
 0x281   :  { %2334 = vmatprep.subr.mxu1 %v2668_v48 }
 0x34e   :  { %v506_v10 = vpop.f32.mrb[4].mxu1 }
 0x34f   :  { %v586_v12 = vmul.f32 0.35355338, %v506_v10  ;;  %v2313_v13 = vpop.f32.mrb[5].mxu1 }
 0x351   :  { %v600_v14 = vadd.f32 %v2942_v9, %v586_v12 }
 0x352   :  { %v582_v16 = vpop.f32.mrb[6].mxu1 }
 0x353   :  { %v587_v17 = vmul.f32 0.35355338, %v582_v16  ;;  %v2318_v18 = vpop.f32.mrb[7].mxu1  ;;  %v602_v19 = vsel %vm433_vm2, %v600_v14, -inf }
 0x354   :  { %603 = vmax.xlane.f32.xlu0 %v602_v19 }
 0x355   :  { %v601_v20 = vadd.f32 %v2945_v15, %v587_v17 }
 0x357   :  { %v605_v21 = vsel %vm433_vm2, %v601_v20, -inf }
 0x358   :  { %606 = vmax.xlane.f32.xlu1 %v605_v21 }
 0x369   :  { %850 = vrot.lane.b32.xlu1 %v2923_v61, %s2671_s3 }
 0x36d   :  { %770 = vrot.lane.b32.xlu1 %v2920_v60, %s2671_s3 }
 0x3e1   :  { %v604_v22 = vpop.xlane.xlu0 %603 }
 0x3e2   :  { %v608_v23 = vsub.f32 %v600_v14, %v604_v22 }
 0x3e4   :  { %v610_v24 = vmul.f32 1.442695, %v608_v23 }
 0x3e5   :  { %v607_v25 = vpop.xlane.xlu1 %606 }
 0x3e6   :  { %2506 = vpow2.f32 %v610_v24  ;;  %v609_v26 = vsub.f32 %v601_v20, %v607_v25 }
 0x3e8   :  { %v612_v27 = vmul.f32 1.442695, %v609_v26 }
 0x3e9   :  { %v851_v32 = vpop.permute.xlu1 %850 }
 0x3ea   :  { %2508 = vpow2.f32 %v612_v27 }
 0x3ed   :  { %v771_v33 = vpop.permute.xlu1 %770 }
 0x3f0   :  { %v2507_v28 = vpop.eup %2506 }
 0x3f1   :  { %v614_v29 = vsel %vm433_vm2, %v2507_v28, 0.0 }
 0x3f2   :  { %615 = vadd.xlane.f32.xlu0 %v614_v29 }
 0x3f4   :  { %v2509_v30 = vpop.eup %2508 }
 0x3f5   :  { %v617_v31 = vsel %vm433_vm2, %v2509_v30, 0.0 }
 0x3f6   :  { %618 = vadd.xlane.f32.xlu1 %v617_v31 }
 0x407   :  { %848 = vrot.lane.b32.xlu1 %v2931_v62, %s2671_s3 }
 0x408   :  { %772 = vrot.lane.b32.xlu0 %v2916_v59, %s2671_s3 }
 0x47f   :  { %v616_v34 = vpop.xlane.xlu0 %615 }
 0x480   :  { %2510 = vrcp.f32 %v616_v34 }
 0x483   :  { %v619_v35 = vpop.xlane.xlu1 %618  ;;  %v773_v38 = vpop.permute.xlu0 %772 }
 0x484   :  { %2512 = vrcp.f32 %v619_v35 }
 0x487   :  { %v849_v41 = vpop.permute.xlu1 %848 }
 0x48a   :  { %v2511_v36 = vpop.eup %2510 }
 0x48b   :  { %v621_v37 = vmul.f32 %v2511_v36, %v2507_v28 }
 0x48d   :  { %2322 = vmatmul.mubr.msk.f32.vlgmr.msra.gmra.mrb[2].mxu0 %vm433_vm2, %v621_v37 }
 0x48e   :  { %v2513_v39 = vpop.eup %2512  ;;  %2330 = vmatpush3.xpose.msk.msra.mxu0 %vm433_vm2, %v773_v38  ;;  %2331 = vmatprep.mubr.msk.f32.mxu0 %vm2669_vm1, %v2668_v48 }
 0x48f   :  { %v623_v40 = vmul.f32 %v2513_v39, %v2509_v30  ;;  %2339 = vmatprep.subr.mxu0 %v2668_v48 }
 0x491   :  { %2327 = vmatmul.mubr.msk.f32.vlgmr.msra.gmra.mrb[8].mxu1 %vm433_vm2, %v623_v40  ;;  %2332 = vmatmul.mubr.msk.f32.vlgmr.msra.gmra.mrb[4].mxu0 %vm433_vm2, %v771_v33 }
 0x492   :  { %2335 = vmatpush3.xpose.msk.msra.mxu1 %vm433_vm2, %v851_v32  ;;  %2336 = vmatprep.mubr.msk.f32.mxu1 %vm2669_vm1, %v2668_v48 }
 0x493   :  { %2344 = vmatprep.subr.mxu1 %v2668_v48  ;;  %2341 = vmatprep.mubr.msk.f32.mxu0 %vm2669_vm1, %v2668_v48 }
 0x495   :  { %2337 = vmatmul.mubr.msk.f32.vlgmr.msra.gmra.mrb[10].mxu1 %vm433_vm2, %v849_v41 }
 0x496   :  { %2346 = vmatprep.mubr.msk.f32.mxu1 %vm2669_vm1, %v2668_v48 }
 0x560   :  { %v2976_v42 = vpop.f32.mrb[2].mxu0 }
 0x561   :  { %v2323_v43 = vpop.f32.mrb[3].mxu0 }
 0x564   :  { %v2978_v44 = vpop.f32.mrb[8].mxu1  ;;  %v844_v45 = vpop.f32.mrb[4].mxu0 }
 0x565   :  { %v926_v46 = vmul.f32 0.35355338, %v844_v45  ;;  %v2328_v47 = vpop.f32.mrb[9].mxu1  ;;  %v2333_v49 = vpop.f32.mrb[5].mxu0 }
 0x567   :  { %v928_v50 = vadd.f32 %v926_v46, %v2942_v9 }
 0x568   :  { %v922_v51 = vpop.f32.mrb[10].mxu1 }
 0x569   :  { %v927_v52 = vmul.f32 0.35355338, %v922_v51  ;;  %v2338_v53 = vpop.f32.mrb[11].mxu1  ;;  %v930_v55 = vsel %vm433_vm2, %v928_v50, -inf }
 0x56a   :  { %931 = vmax.xlane.f32.xlu0 %v930_v55 }
 0x56b   :  { %v929_v56 = vadd.f32 %v927_v52, %v2945_v15 }
 0x56d   :  { %v933_v57 = vsel %vm433_vm2, %v929_v56, -inf }
 0x56e   :  { %934 = vmax.xlane.f32.xlu1 %v933_v57 }
 0x57f   :  { %1030 = vrot.lane.b32.xlu1 %v2934_v63, %s2671_s3 }
 0x580   :  { %953 = vrot.lane.b32.xlu0 %v2906_v54, %s2671_s3 }
 0x583   :  { %1108 = vrot.lane.b32.xlu1 %v2916_v59, %s2672_s5 }
 0x587   :  { %1186 = vrot.lane.b32.xlu1 %v2923_v61, %s2672_s5 }
 0x58b   :  { %1184 = vrot.lane.b32.xlu1 %v2931_v62, %s2672_s5 }
 0x5f7   :  { %v932_v58 = vpop.xlane.xlu0 %931 }
 0x5f8   :  { %v936_v2 = vsub.f32 %v928_v50, %v932_v58 }
 0x5fa   :  { %v938_v3 = vmul.f32 1.442695, %v936_v2 }
 0x5fb   :  { %v954_v4 = vpop.permute.xlu0 %953  ;;  %v935_v5 = vpop.xlane.xlu1 %934 }
 0x5fc   :  { %2514 = vpow2.f32 %v938_v3  ;;  %v937_v6 = vsub.f32 %v929_v56, %v935_v5  ;;  %2340 = vmatpush3.msra.mxu0 %v954_v4 }
 0x5fd   :  { %2349 = vmatprep.subr.mxu0 %v2668_v48 }
 0x5fe   :  { %v940_v7 = vmul.f32 1.442695, %v937_v6 }
 0x5ff   :  { %v1031_v8 = vpop.permute.xlu1 %1030 }
 0x600   :  { %2516 = vpow2.f32 %v940_v7  ;;  %2345 = vmatpush3.msra.mxu1 %v1031_v8 }
 0x601   :  { %2354 = vmatprep.subr.mxu1 %v2668_v48 }
 0x603   :  { %v1109_v17 = vpop.permute.xlu1 %1108 }
 0x606   :  { %v2515_v10 = vpop.eup %2514 }
 0x607   :  { %v942_v11 = vsel %vm433_vm2, %v2515_v10, 0.0  ;;  %v1187_v21 = vpop.permute.xlu1 %1186 }
 0x608   :  { %943 = vadd.xlane.f32.xlu0 %v942_v11 }
 0x60a   :  { %v2517_v12 = vpop.eup %2516 }
 0x60b   :  { %v945_v13 = vsel %vm433_vm2, %v2517_v12, 0.0  ;;  %v1185_v24 = vpop.permute.xlu1 %1184 }
 0x60c   :  { %946 = vadd.xlane.f32.xlu0 %v945_v13 }
 0x622   :  { %1106 = vrot.lane.b32.xlu0 %v2920_v60, %s2672_s5 }
 0x695   :  { %v944_v14 = vpop.xlane.xlu0 %943 }
 0x696   :  { %2518 = vrcp.f32 %v944_v14 }
 0x699   :  { %v947_v16 = vpop.xlane.xlu0 %946 }
 0x69a   :  { %2520 = vrcp.f32 %v947_v16 }
 0x69d   :  { %v1107_v23 = vpop.permute.xlu0 %1106 }
 0x6a0   :  { %v2519_v18 = vpop.eup %2518 }
 0x6a1   :  { %v949_v19 = vmul.f32 %v2519_v18, %v2515_v10 }
 0x6a3   :  { %2342 = vmatmul.mubr.msk.f32.vlgmr.msra.gmra.mrb[6].mxu0 %vm433_vm2, %v949_v19 }
 0x6a4   :  { %v2521_v20 = vpop.eup %2520  ;;  %2350 = vmatpush3.xpose.msk.msra.mxu0 %vm433_vm2, %v1109_v17  ;;  %2351 = vmatprep.mubr.msk.f32.mxu0 %vm2669_vm1, %v2668_v48 }
 0x6a5   :  { %v951_v22 = vmul.f32 %v2521_v20, %v2517_v12  ;;  %2359 = vmatprep.subr.mxu0 %v2668_v48 }
 0x6a7   :  { %2347 = vmatmul.mubr.msk.f32.vlgmr.msra.gmra.mrb[12].mxu1 %vm433_vm2, %v951_v22  ;;  %2352 = vmatmul.mubr.msk.f32.vlgmr.msra.gmra.mrb[8].mxu0 %vm433_vm2, %v1107_v23 }
 0x6a8   :  { %2355 = vmatpush3.xpose.msk.msra.mxu1 %vm433_vm2, %v1187_v21  ;;  %2356 = vmatprep.mubr.msk.f32.mxu1 %vm2669_vm1, %v2668_v48 }
 0x6a9   :  { %2364 = vmatprep.subr.mxu1 %v2668_v48  ;;  %2361 = vmatprep.mubr.msk.f32.mxu0 %vm2669_vm1, %v2668_v48 }
 0x6ab   :  { %2357 = vmatmul.mubr.msk.f32.vlgmr.msra.gmra.mrb[14].mxu1 %vm433_vm2, %v1185_v24 }
 0x6ac   :  { %2366 = vmatprep.mubr.msk.f32.mxu1 %vm2669_vm1, %v2668_v48 }
 0x776   :  { %v3016_v25 = vpop.f32.mrb[6].mxu0 }
 0x777   :  { %v2343_v26 = vpop.f32.mrb[7].mxu0 }
 0x77a   :  { %v3018_v27 = vpop.f32.mrb[12].mxu1  ;;  %v1180_v28 = vpop.f32.mrb[8].mxu0 }
 0x77b   :  { %v1262_v29 = vmul.f32 0.35355338, %v1180_v28  ;;  %v2348_v30 = vpop.f32.mrb[13].mxu1  ;;  %v2353_v31 = vpop.f32.mrb[9].mxu0 }
 0x77d   :  { %v1264_v32 = vadd.f32 %v1262_v29, %v2942_v9 }
 0x77e   :  { %v1258_v33 = vpop.f32.mrb[14].mxu1 }
 0x77f   :  { %v1263_v34 = vmul.f32 0.35355338, %v1258_v33  ;;  %v2358_v35 = vpop.f32.mrb[15].mxu1  ;;  %v1266_v36 = vsel %vm433_vm2, %v1264_v32, -inf }
 0x780   :  { %1267 = vmax.xlane.f32.xlu0 %v1266_v36  ;;  %v1807_v35 = vld [vmem:[#allocation7 + $0x8] sm:$0xff] }
 0x781   :  { %v1265_v37 = vadd.f32 %v1263_v34, %v2945_v15  ;;  %v1806_v34 = vld [vmem:[#allocation7] sm:$0xff] }
 0x782   :  { %v2454_v36 = vpack.c.bf16 %v1807_v35, %v1806_v34  ;;  %v2197_v35 = vld [vmem:[%s3167_s13] ss:$0 sm:$0xff] }
 0x783   :  { %v1269_v38 = vsel %vm433_vm2, %v1265_v37, -inf }
 0x784   :  { %1270 = vmax.xlane.f32.xlu1 %v1269_v38 }
 0x795   :  { %1364 = vrot.lane.b32.xlu1 %v2934_v63, %s2672_s5 }
 0x796   :  { %1288 = vrot.lane.b32.xlu0 %v2906_v54, %s2672_s5 }
 0x799   :  { %1442 = vrot.lane.b32.xlu1 %v2916_v59, %s2673_s7 }
 0x79d   :  { %1520 = vrot.lane.b32.xlu1 %v2923_v61, %s2673_s7 }
 0x7a1   :  { %1518 = vrot.lane.b32.xlu1 %v2931_v62, %s2673_s7 }
 0x80d   :  { %v1268_v39 = vpop.xlane.xlu0 %1267 }
 0x80e   :  { %v1272_v40 = vsub.f32 %v1264_v32, %v1268_v39 }
 0x810   :  { %v1274_v41 = vmul.f32 1.442695, %v1272_v40 }
 0x811   :  { %v1289_v43 = vpop.permute.xlu0 %1288  ;;  %v1271_v45 = vpop.xlane.xlu1 %1270 }
 0x812   :  { %2522 = vpow2.f32 %v1274_v41  ;;  %v1273_v46 = vsub.f32 %v1265_v37, %v1271_v45  ;;  %2360 = vmatpush3.msra.mxu0 %v1289_v43  ;;  %v1809_v37 = vld [vmem:[#allocation7 + $0x18] sm:$0xff] }
 0x813   :  { %2369 = vmatprep.subr.mxu0 %v2668_v48 }
 0x814   :  { %v1276_v47 = vmul.f32 1.442695, %v1273_v46 }
 0x815   :  { %v1365_v49 = vpop.permute.xlu1 %1364 }
 0x816   :  { %2524 = vpow2.f32 %v1276_v47  ;;  %2365 = vmatpush3.msra.mxu1 %v1365_v49 }
 0x817   :  { %2374 = vmatprep.subr.mxu1 %v2668_v48 }
 0x819   :  { %v1443_v53 = vpop.permute.xlu1 %1442 }
 0x81c   :  { %v2523_v59 = vpop.eup %2522 }
 0x81d   :  { %v1278_v61 = vsel %vm433_vm2, %v2523_v59, 0.0  ;;  %v1521_v58 = vpop.permute.xlu1 %1520 }
 0x81e   :  { %1279 = vadd.xlane.f32.xlu0 %v1278_v61 }
 0x820   :  { %v2525_v62 = vpop.eup %2524 }
 0x821   :  { %v1281_v50 = vsel %vm433_vm2, %v2525_v62, 0.0  ;;  %v1519_v3 = vpop.permute.xlu1 %1518 }
 0x822   :  { %1282 = vadd.xlane.f32.xlu0 %v1281_v50 }
 0x838   :  { %1440 = vrot.lane.b32.xlu0 %v2920_v60, %s2673_s7 }
 0x8ab   :  { %v1280_v51 = vpop.xlane.xlu0 %1279 }
 0x8ac   :  { %2526 = vrcp.f32 %v1280_v51 }
 0x8af   :  { %v1283_v52 = vpop.xlane.xlu0 %1282 }
 0x8b0   :  { %2528 = vrcp.f32 %v1283_v52 }
 0x8b3   :  { %v1441_v60 = vpop.permute.xlu0 %1440 }
 0x8b6   :  { %v2527_v55 = vpop.eup %2526 }
 0x8b7   :  { %v1285_v56 = vmul.f32 %v2527_v55, %v2523_v59 }
 0x8b9   :  { %2362 = vmatmul.mubr.msk.f32.vlgmr.msra.gmra.mrb[10].mxu0 %vm433_vm2, %v1285_v56  ;;  %v2193_v56 = vld [vmem:[%s3163_s9] ss:$0 sm:$0xff] }
 0x8ba   :  { %v2529_v57 = vpop.eup %2528  ;;  %2370 = vmatpush3.xpose.msk.msra.mxu0 %vm433_vm2, %v1443_v53  ;;  %2371 = vmatprep.mubr.msk.f32.mxu0 %vm2669_vm1, %v2668_v48 }
 0x8bb   :  { %v1287_v2 = vmul.f32 %v2529_v57, %v2525_v62  ;;  %2379 = vmatprep.subr.mxu0 %v2668_v48 }
 0x8bd   :  { %2367 = vmatmul.mubr.msk.f32.vlgmr.msra.gmra.mrb[16].mxu1 %vm433_vm2, %v1287_v2  ;;  %2372 = vmatmul.mubr.msk.f32.vlgmr.msra.gmra.mrb[12].mxu0 %vm433_vm2, %v1441_v60 }
 0x8be   :  { %2375 = vmatpush3.xpose.msk.msra.mxu1 %vm433_vm2, %v1521_v58  ;;  %2376 = vmatprep.mubr.msk.f32.mxu1 %vm2669_vm1, %v2668_v48 }
 0x8bf   :  { %2384 = vmatprep.subr.mxu1 %v2668_v48  ;;  %2381 = vmatprep.mubr.msk.f32.mxu0 %vm2669_vm1, %v2668_v48 }
 0x8c1   :  { %2377 = vmatmul.mubr.msk.f32.vlgmr.msra.gmra.mrb[18].mxu1 %vm433_vm2, %v1519_v3 }
 0x8c2   :  { %2386 = vmatprep.mubr.msk.f32.mxu1 %vm2669_vm1, %v2668_v48 }
 0x98c   :  { %v1360_v4 = vpop.f32.mrb[10].mxu0 }
 0x98d   :  { %v2363_v5 = vpop.f32.mrb[11].mxu0 }
 0x990   :  { %v1436_v6 = vpop.f32.mrb[16].mxu1  ;;  %v1514_v7 = vpop.f32.mrb[12].mxu0 }
 0x991   :  { %v1596_v8 = vmul.f32 0.35355338, %v1514_v7  ;;  %v2368_v10 = vpop.f32.mrb[17].mxu1  ;;  %v2373_v11 = vpop.f32.mrb[13].mxu0 }
 0x993   :  { %v1598_v12 = vadd.f32 %v1596_v8, %v2942_v9 }
 0x994   :  { %v1592_v13 = vpop.f32.mrb[18].mxu1 }
 0x995   :  { %v1597_v14 = vmul.f32 0.35355338, %v1592_v13  ;;  %v2378_v16 = vpop.f32.mrb[19].mxu1  ;;  %v1600_v17 = vsel %vm433_vm2, %v1598_v12, -inf }
 0x996   :  { %1601 = vmax.xlane.f32.xlu0 %v1600_v17  ;;  %v1945_v16 = vld [vmem:[#allocation8 + $0x8] sm:$0xff] }
 0x997   :  { %v1599_v18 = vadd.f32 %v1597_v14, %v2945_v15  ;;  %v1944_v14 = vld [vmem:[#allocation8] sm:$0xff] }
 0x998   :  { %v2462_v17 = vpack.c.bf16 %v1945_v16, %v1944_v14 }
 0x999   :  { %v1603_v19 = vsel %vm433_vm2, %v1599_v18, -inf }
 0x99a   :  { %1604 = vmax.xlane.f32.xlu1 %v1603_v19  ;;  %v1947_v19 = vld [vmem:[#allocation8 + $0x18] sm:$0xff] }
 0x9ab   :  { %1698 = vrot.lane.b32.xlu1 %v2934_v63, %s2673_s7 }
 0x9af   :  { %1776 = vrot.lane.b32.xlu1 %v3016_v25, %s3188_s1 }
 0x9b3   :  { %1778 = vrot.lane.b32.xlu1 %v3018_v27, %s3188_s1 }
 0x9b7   :  { %1786 = vrot.lane.b32.xlu1 %v1436_v6, %s2664_s28 }
 0xa23   :  { %v1602_v48 = vpop.xlane.xlu0 %1601 }
 0xa24   :  { %v1606_v9 = vsub.f32 %v1598_v12, %v1602_v48 }
 0xa26   :  { %v1608_v20 = vmul.f32 1.442695, %v1606_v9  ;;  %v2038_v9 = vld [vmem:[%s3170_s16] sm:$0xff] }
 0xa27   :  { %v1605_v21 = vpop.xlane.xlu1 %1604 }
 0xa28   :  { %2530 = vpow2.f32 %v1608_v20  ;;  %v1607_v15 = vsub.f32 %v1599_v18, %v1605_v21  ;;  %v1946_v18 = vld [vmem:[#allocation8 + $0x10] sm:$0xff]  ;;  %v2040_v21 = vld [vmem:[%s3170_s16 + $0x10] sm:$0xff] }
 0xa29   :  { %v2466_v48 = vpack.c.bf16 %v1947_v19, %v1946_v18  ;;  %v2039_v20 = vld [vmem:[%s3170_s16 + $0x8] sm:$0xff] }
 0xa2a   :  { %v1610_v22 = vmul.f32 1.442695, %v1607_v15  ;;  %v2470_v15 = vpack.c.bf16 %v2039_v20, %v2038_v9 }
 0xa2b   :  { %v1699_v23 = vpop.permute.xlu1 %1698 }
 0xa2c   :  { %2532 = vpow2.f32 %v1610_v22  ;;  %2385 = vmatpush3.msra.mxu1 %v1699_v23  ;;  %v2041_v22 = vld [vmem:[%s3170_s16 + $0x18] sm:$0xff] }
 0xa2d   :  { %2463 = vmatprep.subr.bf16.mxu1 %v2462_v17  ;;  %v2474_v23 = vpack.c.bf16 %v2041_v22, %v2040_v21 }
 0xa2f   :  { %v1777_v45 = vpop.permute.xlu1 %1776 }
 0xa30   :  { %v1798_v49 = vsel %vm433_vm2, %v2976_v42, %v1777_v45 }
 0xa32   :  { %v2531_v24 = vpop.eup %2530 }
 0xa33   :  { %v1612_v63 = vsel %vm433_vm2, %v2531_v24, 0.0  ;;  %v1779_v46 = vpop.permute.xlu1 %1778 }
 0xa34   :  { %1613 = vadd.xlane.f32.xlu0 %v1612_v63  ;;  %v1799_v51 = vsel %vm433_vm2, %v2978_v44, %v1779_v46  ;;  %v2043_v63 = vld [vmem:[%s3170_s16 + $0x28] sm:$0xff]  ;;  %v2198_v46 = vld [vmem:[%s3169_s15] ss:$0 sm:$0xff] }
 0xa36   :  { %v2533_v25 = vpop.eup %2532 }
 0xa37   :  { %v1615_v26 = vsel %vm433_vm2, %v2533_v25, 0.0  ;;  %v1787_v59 = vpop.permute.xlu1 %1786 }
 0xa38   :  { %1616 = vadd.xlane.f32.xlu0 %v1615_v26  ;;  %v1802_v52 = vsel %vm1800_vm6, %v1799_v51, %v1787_v59 }
 0xa4e   :  { %1622 = vrot.lane.b32.xlu0 %v2906_v54, %s2673_s7  ;;  %v1808_v54 = vld [vmem:[#allocation7 + $0x10] sm:$0xff] }
 0xa4f   :  { %v2458_v38 = vpack.c.bf16 %v1809_v37, %v1808_v54 }
 0xa52   :  { %1784 = vrot.lane.b32.xlu0 %v1360_v4, %s2664_s28  ;;  %s2674_s28 = smov 24  }
 0xac1   :  { %v1614_v27 = vpop.xlane.xlu0 %1613 }
 0xac2   :  { %2534 = vrcp.f32 %v1614_v27 }
 0xac5   :  { %v1617_v28 = vpop.xlane.xlu0 %1616 }
 0xac6   :  { %2536 = vrcp.f32 %v1617_v28 }
 0xac9   :  { %v1623_v29 = vpop.permute.xlu0 %1622 }
 0xaca   :  { %2380 = vmatpush3.msra.mxu0 %v1623_v29 }
 0xacb   :  { %2455 = vmatprep.subr.bf16.mxu0 %v2454_v36 }
 0xacc   :  { %v2535_v30 = vpop.eup %2534 }
 0xacd   :  { %v1619_v31 = vmul.f32 %v2535_v30, %v2531_v24  ;;  %v1785_v47 = vpop.permute.xlu0 %1784  ;;  %v2042_v24 = vld [vmem:[%s3170_s16 + $0x20] sm:$0xff] }
 0xace   :  { %v1801_v61 = vsel %vm1800_vm6, %v1798_v49, %v1785_v47 }
 0xacf   :  { %2382 = vmatmul.mubr.msk.f32.vlgmr.msra.gmra.mrb[14].mxu0 %vm433_vm2, %v1619_v31 }
 0xad0   :  { %v2537_v32 = vpop.eup %2536  ;;  %2457 = vmatpush3.bf16.msra.mxu0 %v2454_v36 }
 0xad1   :  { %v1621_v33 = vmul.f32 %v2537_v32, %v2533_v25  ;;  %2459 = vmatprep.subr.bf16.mxu0 %v2458_v38  ;;  %v2478_v25 = vpack.c.bf16 %v2043_v63, %v2042_v24 }
 0xad3   :  { %2387 = vmatmul.mubr.msk.f32.vlgmr.msra.gmra.mrb[20].mxu1 %vm433_vm2, %v1621_v33  ;;  %v2196_v33 = vld [vmem:[%s3166_s12] ss:$0 sm:$0xff] }
 0xad4   :  { %2461 = vmatpush3.bf16.msra.mxu0 %v2458_v38  ;;  %2465 = vmatpush3.bf16.msra.mxu1 %v2462_v17 }
 0xad5   :  { %2467 = vmatprep.subr.bf16.mxu1 %v2466_v48  ;;  %2471 = vmatprep.subr.bf16.mxu0 %v2470_v15 }
 0xad8   :  { %2469 = vmatpush3.bf16.msra.mxu1 %v2466_v48 }
 0xba2   :  { %v1694_v39 = vpop.f32.mrb[14].mxu0 }
 0xba3   :  { %1792 = vrot.lane.b32.xlu0 %v1694_v39, %s2674_s28  ;;  %v2383_v40 = vpop.f32.mrb[15].mxu0 }
 0xba6   :  { %v1770_v41 = vpop.f32.mrb[20].mxu1 }
 0xba7   :  { %1794 = vrot.lane.b32.xlu1 %v1770_v41, %s2674_s28  ;;  %v2388_v43 = vpop.f32.mrb[21].mxu1  ;;  %v2044_v41 = vld [vmem:[%s3170_s16 + $0x30] sm:$0xff]  ;;  %s3191_s28 = sld [smem:[#allocation18_spill]] }
 0xba8   :  { %v2045_v43 = vld [vmem:[%s3170_s16 + $0x38] sm:$0xff]  ;;  %s2675_s16 = smov [#allocation10]  }
 0xba9   :  { %v2482_v45 = vpack.c.bf16 %v2045_v43, %v2044_v41  ;;  %s2144_s18 = sshll.u32 %s2675_s16, 4  ;;  %s2145_s18 = int_to_ptr.vmem [resolvable:$true] %s2144_s18 }
 0xbaa   :  { %s2630_s15 = scalar_lea.vmem %s2145_s18, 256  ;;  %p2635_p5 = scmp.lt.s32.totalorder %s2145_s18, %s2145_s18 }
 0xbab   :  { %p2631_p4 = scmp.ne.s32.totalorder %s2145_s18, %s2630_s15  ;;  %p2636_p6 = scmp.lt.s32.totalorder %s2630_s15, %s2630_s15 }
 0xbad   :  { %v2201_v51 = vld [vmem:[%s3191_s28] ss:$0 sm:$0xff]  ;;  %p2637_p7 = por %p2636_p6, %p2635_p5 }
 0xbaf   :  { %p2638_p8 = pnand %p2637_p7, %p2631_p4 }
 0xc15   :  { %v1793_v62 = vpop.permute.xlu0 %1792 }
 0xc16   :  { %v1804_v50 = vsel %vm1803_vm5, %v1801_v61, %v1793_v62 }
 0xc17   :  { %2397 = vmatprep.mubr.msk.f32.mxu0 %vm119_vm0, %v1804_v50 }
 0xc19   :  { %v1795_v53 = vpop.permute.xlu1 %1794 }
 0xc1a   :  { %v1805_v55 = vsel %vm1803_vm5, %v1802_v52, %v1795_v53 }
 0xc1b   :  { %2398 = vmatmul.mubr.msk.f32.vlgmr.msra.gmra.mrb[16].mxu0 %vm119_vm0, %v1805_v55 }
 0xc1c   :  { %2473 = vmatpush3.bf16.msra.mxu0 %v2470_v15 }
 0xc1d   :  { %2475 = vmatprep.subr.bf16.mxu0 %v2474_v23 }
 0xc20   :  { %2477 = vmatpush3.bf16.msra.mxu0 %v2474_v23 }
 0xc21   :  { %2479 = vmatprep.subr.bf16.mxu0 %v2478_v25 }
 0xc24   :  { %2481 = vmatpush3.bf16.msra.mxu0 %v2478_v25 }
 0xc25   :  { %2483 = vmatprep.subr.bf16.mxu0 %v2482_v45 }
 0xc28   :  { %2485 = vmatpush3.bf16.msra.mxu0 %v2482_v45 }
 0xcee   :  { %v2399_v42 = vpop.f32.mrb[16].mxu0 }
 0xcef   :  { %v1895_v57 = vadd.f32 %v2399_v42, %v2193_v56  ;;  %v1889_v58 = vpop.f32.mrb[17].mxu0 }
 0xcf0   :  { %v1890_v2 = vadd.f32 %v2193_v56, %v1889_v58 }
 0xcf1   :  { %v3084_v60 = vadd.f32 %v1895_v57, %v2839_v1 }
 0xcf2   :  { %v3087_v3 = vadd.f32 %v1890_v2, %v2837_v0 }
 0xcf3   :  { %v1905_v44 = vsel %vm119_vm0, %v3084_v60, 0.0 }
 0xcf4   :  { %1906 = vadd.xlane.f32.xlu1 %v1905_v44  ;;  %v1902_v4 = vsel %vm119_vm0, %v3087_v3, 0.0 }
 0xcf5   :  { %1903 = vadd.xlane.f32.xlu0 %v1902_v4 }
 0xd81   :  { %v1907_v5 = vpop.xlane.xlu1 %1906 }
 0xd82   :  { %v1909_v6 = vmul.f32 0.03125, %v1907_v5  ;;  %v1904_v7 = vpop.xlane.xlu0 %1903 }
 0xd83   :  { %v1908_v8 = vmul.f32 0.03125, %v1904_v7 }
 0xd84   :  { %v1911_v10 = vsub.f32 %v3084_v60, %v1909_v6 }
 0xd85   :  { %v1910_v1 = vsub.f32 %v3087_v3, %v1908_v8 }
 0xd86   :  { %v1913_v12 = vmul.f32 %v1911_v10, %v1911_v10 }
 0xd87   :  { %v1912_v11 = vmul.f32 %v1910_v1, %v1910_v1 }
 0xd88   :  { %v1917_v13 = vsel %vm119_vm0, %v1913_v12, 0.0 }
 0xd89   :  { %v1914_v0 = vsel %vm119_vm0, %v1912_v11, 0.0 }
 0xd8a   :  { %1915 = vadd.xlane.f32.xlu0 %v1914_v0 }
 0xd8e   :  { %1918 = vadd.xlane.f32.xlu0 %v1917_v13 }
 0xe17   :  { %v1916_v26 = vpop.xlane.xlu0 %1915 }
 0xe18   :  { %v1920_v27 = vmul.f32 0.03125, %v1916_v26 }
 0xe1a   :  { %v1922_v28 = vadd.f32 1e-05, %v1920_v27 }
 0xe1b   :  { %v1919_v29 = vpop.xlane.xlu0 %1918 }
 0xe1c   :  { %2538 = vrsqrt.f32 %v1922_v28  ;;  %v1921_v30 = vmul.f32 0.03125, %v1919_v29 }
 0xe1e   :  { %v1923_v31 = vadd.f32 1e-05, %v1921_v30 }
 0xe20   :  { %2540 = vrsqrt.f32 %v1923_v31 }
 0xe26   :  { %v2539_v32 = vpop.eup %2538 }
 0xe27   :  { %v1926_v34 = vmul.f32 %v2539_v32, %v1910_v1 }
 0xe29   :  { %v1934_v36 = vmul.f32 %v2196_v33, %v1926_v34 }
 0xe2a   :  { %v2541_v54 = vpop.eup %2540 }
 0xe2b   :  { %v1927_v37 = vmul.f32 %v2541_v54, %v1911_v10  ;;  %v1942_v38 = vadd.f32 %v2197_v35, %v1934_v36 }
 0xe2d   :  { %v1935_v39 = vmul.f32 %v2196_v33, %v1927_v37  ;;  %2408 = vmatprep.mubr.msk.f32.mxu1 %vm119_vm0, %v1942_v38 }
 0xe2f   :  { %v1943_v40 = vadd.f32 %v2197_v35, %v1935_v39 }
 0xe31   :  { %2409 = vmatmul.mubr.msk.f32.vlgmr.msra.gmra.mrb[22].mxu1 %vm119_vm0, %v1943_v40 }
 0xf04   :  { %v2410_v47 = vpop.f32.mrb[22].mxu1 }
 0xf05   :  { %v2033_v49 = vadd.f32 %v2410_v47, %v2198_v46  ;;  %v2027_v59 = vpop.f32.mrb[23].mxu1 }
 0xf06   :  { %v2028_v61 = vadd.f32 %v2198_v46, %v2027_v59 }
 0xf07   :  { %v2037_v50 = vmax.f32 %v2033_v49, 0.0 }
 0xf08   :  { %v2036_v62 = vmax.f32 %v2028_v61, 0.0 }
 0xf0a   :  { %2427 = vmatprep.mubr.msk.f32.mxu0 %vm2053_vm7, %v2036_v62 }
 0xf0b   :  { %2428 = vmatmul.mubr.msk.f32.vlgmr.msra.gmra.mrb[18].mxu0 %vm2053_vm7, %v2037_v50 }
 0xfde   :  { %v2429_v52 = vpop.f32.mrb[18].mxu0 }
 0xfdf   :  { %v2132_v53 = vadd.f32 %v2429_v52, %v2201_v51  ;;  %v2126_v55 = vpop.f32.mrb[19].mxu0 }
 0xfe0   :  { %v2127_v56 = vadd.f32 %v2201_v51, %v2126_v55 }
 0xfe1   :  { %v2136_v42 = vadd.f32 %v2132_v53, %v3084_v60 }
 0xfe2   :  { %v2135_v57 = vadd.f32 %v2127_v56, %v3087_v3 }
 0xfe3   :  { %2138 = vst.msk [vmem:[#allocation10 + $0x8] sm:$0xff] %vm119_vm0, %v2136_v42 }
 0xfe4   :  { %2137 = vst.msk [vmem:[#allocation10] sm:$0xff] %vm119_vm0, %v2135_v57 }
 0xfe5   :  { %2641 = shalt.err (!%p2638_p8)
}
 0xfe6   :  { %s3192_s19 = sld [smem:[#allocation19_spill]] }
 0xfec   :  { %s2642_s2 = scalar_lea.hbm %s3192_s19, 256 }
 0xfed   :  { %p2643_p9 = scmp.ne.s32.totalorder %s3192_s19, %s2642_s2  ;;  %p2646_p10 = scmp.lt.u32.totalorder %s2642_s2, %s3192_s19 }
 0xfef   :  { %p2648_p11 = pnand %p2646_p10, %p2643_p9 }
 0xff1   :  { %2651 = shalt.err (!%p2648_p11)
}
 0xff2   :  { %2150 = dma.vmem_to_hbm [thread:$0]  %s2145_s18, 256, %s3192_s19, [#allocation4], %s3189_s0, %s3189_s0, %s3188_s1  }
 0xff3   :  { %2658 = dma.done.wait [#allocation4], 256  }
 0xff4   :  { %2659 = vsyncadd [#allocation4], 4294967040 }
 0xff5   :  { %2154 = vsyncpa [#allocation3], 1 }
 0xff6   :  { %2155 = vsyncpa [#allocation6], 1 }
 0xff7   :  { %2156 = vsyncpa [#allocation9], 1 }
 0xff8   :  { %2157 = vsyncpa [#allocation4], 1 }

</bundles_post_ra>
